<compile_context>
chip_gen: v7x
topology: tpu7x:2x2x1
jax: 0.10.0
libtpu: 0.0.40
codegen_flags: <defaults>
</compile_context>

<pallas_src>
import jax
import jax.numpy as jnp
from jax.experimental import pallas as pl
from jax.experimental.pallas import tpu as pltpu


def _mlp_kernel(xp_ref, w1p_ref, b1p_ref, w2p_ref, b2p_ref, w3p_ref, b3p_ref, o_ref):
    """One batch tile in packed layout.

    xp_ref : (tbp, 128)        -- 16 samples per row, lane-dense
    w*p    : kron(I_16, W)     -- block-diagonal packed weights, resident in VMEM
    b*p    : (1, 16*width) f32 -- tiled biases, broadcast over sublanes
    o_ref  : (tbp, 16) f32     -- one sigmoid output per packed sample
    """
    w1p = w1p_ref[...]
    # In-kernel cast to the compute dtype (bf16 path): no extra HBM traffic.
    xp = xp_ref[...].astype(w1p.dtype)

    # Layer 1: (tbp, 128) @ (128, 1024) -> (tbp, 1024); full 128-deep contraction.
    h1 = jnp.dot(xp, w1p, preferred_element_type=jnp.float32)
    h1 = jnp.maximum(h1 + b1p_ref[...], 0.0)
    # Dropout = identity in eval mode.

    # Layer 2: (tbp, 1024) @ (1024, 512) -> (tbp, 512)
    w2p = w2p_ref[...]
    h2 = jnp.dot(h1.astype(w2p.dtype), w2p, preferred_element_type=jnp.float32)
    h2 = jnp.maximum(h2 + b2p_ref[...], 0.0)

    # Output layer: (tbp, 512) @ (512, 16) -> (tbp, 16)
    w3p = w3p_ref[...]
    logits = jnp.dot(h2.astype(w3p.dtype), w3p, preferred_element_type=jnp.float32)
    logits = logits + b3p_ref[...]

    # Sigmoid: exp and reciprocal both run on the otherwise-idle EUP slot.
    denom = 1.0 + jnp.exp(-logits)
    o_ref[...] = pl.reciprocal(denom, approx=False).astype(o_ref.dtype)


def _round_up(n, m):
    return (n + m - 1) // m * m


def nn_classifier_forward(x, params, *, block_b=16384, compute_dtype=jnp.float32):
    """x: (B, config[0]) float32; params: dict w1,b1,w2,b2,w3,b3 (w: (in,out), b: (1,out))."""
    assert block_b % 128 == 0 and block_b > 0, "block_b must be a positive multiple of 128"
    w1, b1, w2, b2, w3, b3 = (params["w1"], params["b1"], params["w2"],
                              params["b2"], params["w3"], params["b3"])
    B, f_in = x.shape
    h1d, h2d = w1.shape[1], w2.shape[1]
    assert w1.shape[0] == f_in and w3.shape[1] == 1
    assert 128 % f_in == 0, "packed layout requires the input width to divide 128"
    pack = 128 // f_in                                    # samples packed per 128-lane row

    # --- Block-diagonal weight packing (tiny, resident in VMEM across all grid steps) ---
    eye = jnp.eye(pack, dtype=jnp.float32)
    w1p = jnp.kron(eye, w1).astype(compute_dtype)         # (128, pack*h1d)
    w2p = jnp.kron(eye, w2).astype(compute_dtype)         # (pack*h1d, pack*h2d)
    w3p = jnp.kron(eye, w3).astype(compute_dtype)         # (pack*h2d, pack)
    b1p = jnp.tile(b1.reshape(1, h1d), (1, pack)).astype(jnp.float32)
    b2p = jnp.tile(b2.reshape(1, h2d), (1, pack)).astype(jnp.float32)
    b3p = jnp.tile(b3.reshape(1, 1), (1, pack)).astype(jnp.float32)

    # --- Batch tiling (lane-dense, samples packed 16/row) ---
    b128 = _round_up(B, 128)
    tb = min(block_b, b128)
    # v7x megacore: keep >=2 grid steps when the batch spans >=2 lane groups so
    # dimension_semantics=("parallel",) can shard across both TensorCores.
    if tb == b128 and b128 >= 256 and B > 128:
        tb = _round_up(b128 // 2, 128)
    b_pad = _round_up(B, tb)
    grid = (b_pad // tb,)

    if b_pad != B:
        x = jnp.pad(x, ((0, b_pad - B), (0, 0)))
    rows = b_pad // pack
    tbp = tb // pack                                       # packed rows per tile (multiple of 8)
    xp = x.reshape(rows, pack * f_in)                      # free, contiguous reshape

    flops = 2 * b_pad * (f_in * h1d + h1d * h2d + h2d)
    bytes_accessed = 4 * (b_pad * f_in + b_pad) + int(
        w1p.size + w2p.size + w3p.size + b1p.size + b2p.size + b3p.size
    ) * jnp.dtype(compute_dtype).itemsize

    out_p = pl.pallas_call(
        _mlp_kernel,
        out_shape=jax.ShapeDtypeStruct((rows, pack), jnp.float32),
        grid=grid,
        in_specs=[
            pl.BlockSpec((tbp, pack * f_in), lambda i: (i, 0)),   # x: streamed, lane-dense
            pl.BlockSpec(w1p.shape, lambda i: (0, 0)),            # packed weights: resident
            pl.BlockSpec(b1p.shape, lambda i: (0, 0)),
            pl.BlockSpec(w2p.shape, lambda i: (0, 0)),
            pl.BlockSpec(b2p.shape, lambda i: (0, 0)),
            pl.BlockSpec(w3p.shape, lambda i: (0, 0)),
            pl.BlockSpec(b3p.shape, lambda i: (0, 0)),
        ],
        out_specs=pl.BlockSpec((tbp, pack), lambda i: (i, 0)),
        compiler_params=pltpu.CompilerParams(
            dimension_semantics=("parallel",),
            vmem_limit_bytes=48 * 1024 * 1024),
        cost_estimate=pl.CostEstimate(
            flops=flops, transcendentals=2 * b_pad, bytes_accessed=bytes_accessed),
    )(xp, w1p, b1p, w2p, b2p, w3p, b3p)

    # out_p[i, j] is the output of sample i*pack + j; unpack and drop padding.
    return out_p.reshape(b_pad)[:B].reshape(B, 1)


def init_params(key, config=(8, 64, 32, 1)):
    """Deterministic init mirroring nn.Linear shapes (stored as (in, out))."""
    params = {}
    ks = jax.random.split(key, 2 * (len(config) - 1))
    for idx in range(len(config) - 1):
        fan_in, fan_out = config[idx], config[idx + 1]
        bound = 1.0 / jnp.sqrt(fan_in)
        w = jax.random.uniform(ks[2 * idx], (fan_in, fan_out),
                               minval=-bound, maxval=bound, dtype=jnp.float32)
        b = jax.random.uniform(ks[2 * idx + 1], (1, fan_out),
                               minval=-bound, maxval=bound, dtype=jnp.float32)
        params[f"w{idx + 1}"] = w
        params[f"b{idx + 1}"] = b
    return params


def _reference(x, p):
    h1 = jnp.maximum(x @ p["w1"] + p["b1"], 0.0)
    h2 = jnp.maximum(h1 @ p["w2"] + p["b2"], 0.0)
    return jax.nn.sigmoid(h2 @ p["w3"] + p["b3"])


if __name__ == "__main__":
    key = jax.random.PRNGKey(0)
    k_param, k_x, k_x2, k_x3 = jax.random.split(key, 4)
    config = (8, 64, 32, 1)
    params = init_params(k_param, config)

    # Small demo batch, matching the module's (B, 8) input (single-tile grid).
    x = jax.random.normal(k_x, (2, config[0]), dtype=jnp.float32)
    out = jax.block_until_ready(nn_classifier_forward(x, params))
    ref = _reference(x, params)
    assert out.shape == (2, config[-1])
    assert jnp.allclose(out, ref, atol=1e-5, rtol=1e-5), "mismatch vs reference (B=2)"

    # Multi-step grid with a non-divisible batch (3 tiles of 128 samples, B=260).
    x2 = jax.random.normal(k_x2, (260, config[0]), dtype=jnp.float32)
    out2 = jax.block_until_ready(nn_classifier_forward(x2, params, block_b=128))
    ref2 = _reference(x2, params)
    assert out2.shape == (260, config[-1])
    assert jnp.allclose(out2, ref2, atol=1e-5, rtol=1e-5), "mismatch vs reference (B=260)"

    # bf16 MXU path (v6e/v7x recommendation) + automatic 2-way tile split (grid=2).
    x3 = jax.random.normal(k_x3, (512, config[0]), dtype=jnp.float32)
    out3 = jax.block_until_ready(
        nn_classifier_forward(x3, params, compute_dtype=jnp.bfloat16))
    ref3 = _reference(x3, params)
    assert out3.shape == (512, config[-1])
    assert jnp.allclose(out3, ref3, atol=3e-2, rtol=3e-2), "mismatch vs reference (bf16)"

    print("KERNEL_OK")
</pallas_src>

<mosaic_0001>
module attributes {stable_mosaic.version = 11 : i64} {
  func.func @_mlp_kernel(%arg0: i32, %arg1: memref<8x128xf32, #tpu.memory_space<vmem>>, %arg2: memref<128x1024xf32, #tpu.memory_space<vmem>>, %arg3: memref<1x1024xf32, #tpu.memory_space<vmem>>, %arg4: memref<1024x512xf32, #tpu.memory_space<vmem>>, %arg5: memref<1x512xf32, #tpu.memory_space<vmem>>, %arg6: memref<512x16xf32, #tpu.memory_space<vmem>>, %arg7: memref<1x16xf32, #tpu.memory_space<vmem>>, %arg8: memref<8x16xf32, #tpu.memory_space<vmem>>) attributes {dimension_semantics = [#tpu.dimension_semantics<parallel>], iteration_bounds = array<i64: 1>, scalar_prefetch = 0 : i64, scratch_operands = 0 : i64, tpu.core_type = #tpu.core_type<tc>, window_params = [{transform_indices = @transform_0, window_bounds = array<i64: 8, 128>}, {pipeline_mode = #tpu.pipeline_mode<synchronous>, transform_indices = @transform_1, window_bounds = array<i64: 128, 1024>}, {pipeline_mode = #tpu.pipeline_mode<synchronous>, transform_indices = @transform_2, window_bounds = array<i64: 1, 1024>}, {pipeline_mode = #tpu.pipeline_mode<synchronous>, transform_indices = @transform_3, window_bounds = array<i64: 1024, 512>}, {pipeline_mode = #tpu.pipeline_mode<synchronous>, transform_indices = @transform_4, window_bounds = array<i64: 1, 512>}, {pipeline_mode = #tpu.pipeline_mode<synchronous>, transform_indices = @transform_5, window_bounds = array<i64: 512, 16>}, {pipeline_mode = #tpu.pipeline_mode<synchronous>, transform_indices = @transform_6, window_bounds = array<i64: 1, 16>}, {transform_indices = @transform_7, window_bounds = array<i64: 8, 16>}]} {
    %c0 = arith.constant 0 : index
    %c0_0 = arith.constant 0 : index
    %0 = vector.load %arg2[%c0, %c0_0] : memref<128x1024xf32, #tpu.memory_space<vmem>>, vector<128x1024xf32>
    %c0_1 = arith.constant 0 : index
    %c0_2 = arith.constant 0 : index
    %1 = vector.load %arg1[%c0_1, %c0_2] : memref<8x128xf32, #tpu.memory_space<vmem>>, vector<8x128xf32>
    %cst = arith.constant dense<0.000000e+00> : vector<8x1024xf32>
    %2 = tpu.matmul %1, %0, %cst {dimension_numbers = #tpu.dot_dimension_numbers<[1], [0], [0], [1], [0, 0, 1, 1], [], []>} : vector<8x128xf32>, vector<128x1024xf32>, vector<8x1024xf32> -> vector<8x1024xf32>
    %c0_3 = arith.constant 0 : index
    %c0_4 = arith.constant 0 : index
    %3 = vector.load %arg3[%c0_3, %c0_4] : memref<1x1024xf32, #tpu.memory_space<vmem>>, vector<1x1024xf32>
    %4 = vector.broadcast %3 : vector<1x1024xf32> to vector<8x1024xf32>
    %5 = arith.addf %2, %4 : vector<8x1024xf32>
    %cst_5 = arith.constant 0.000000e+00 : f32
    %6 = vector.broadcast %cst_5 : f32 to vector<8x1024xf32>
    %7 = arith.maximumf %5, %6 : vector<8x1024xf32>
    %c0_6 = arith.constant 0 : index
    %c0_7 = arith.constant 0 : index
    %8 = vector.load %arg4[%c0_6, %c0_7] : memref<1024x512xf32, #tpu.memory_space<vmem>>, vector<1024x512xf32>
    %cst_8 = arith.constant dense<0.000000e+00> : vector<8x512xf32>
    %9 = tpu.matmul %7, %8, %cst_8 {dimension_numbers = #tpu.dot_dimension_numbers<[1], [0], [0], [1], [0, 0, 1, 1], [], []>} : vector<8x1024xf32>, vector<1024x512xf32>, vector<8x512xf32> -> vector<8x512xf32>
    %c0_9 = arith.constant 0 : index
    %c0_10 = arith.constant 0 : index
    %10 = vector.load %arg5[%c0_9, %c0_10] : memref<1x512xf32, #tpu.memory_space<vmem>>, vector<1x512xf32>
    %11 = vector.broadcast %10 : vector<1x512xf32> to vector<8x512xf32>
    %12 = arith.addf %9, %11 : vector<8x512xf32>
    %cst_11 = arith.constant 0.000000e+00 : f32
    %13 = vector.broadcast %cst_11 : f32 to vector<8x512xf32>
    %14 = arith.maximumf %12, %13 : vector<8x512xf32>
    %c0_12 = arith.constant 0 : index
    %c0_13 = arith.constant 0 : index
    %15 = vector.load %arg6[%c0_12, %c0_13] : memref<512x16xf32, #tpu.memory_space<vmem>>, vector<512x16xf32>
    %cst_14 = arith.constant dense<0.000000e+00> : vector<8x16xf32>
    %16 = tpu.matmul %14, %15, %cst_14 {dimension_numbers = #tpu.dot_dimension_numbers<[1], [0], [0], [1], [0, 0, 1, 1], [], []>} : vector<8x512xf32>, vector<512x16xf32>, vector<8x16xf32> -> vector<8x16xf32>
    %c0_15 = arith.constant 0 : index
    %c0_16 = arith.constant 0 : index
    %17 = vector.load %arg7[%c0_15, %c0_16] : memref<1x16xf32, #tpu.memory_space<vmem>>, vector<1x16xf32>
    %18 = vector.broadcast %17 : vector<1x16xf32> to vector<8x16xf32>
    %19 = arith.addf %16, %18 : vector<8x16xf32>
    %cst_17 = arith.constant 0.000000e+00 : f32
    %20 = vector.broadcast %cst_17 : f32 to vector<8x16xf32>
    %21 = arith.subf %20, %19 : vector<8x16xf32>
    %22 = math.exp %21 : vector<8x16xf32>
    %cst_18 = arith.constant 1.000000e+00 : f32
    %23 = vector.broadcast %cst_18 : f32 to vector<8x16xf32>
    %24 = arith.addf %23, %22 : vector<8x16xf32>
    %25 = tpu.reciprocal %24 : vector<8x16xf32> -> vector<8x16xf32>
    %c0_19 = arith.constant 0 : index
    %c0_20 = arith.constant 0 : index
    %26 = vector.load %arg8[%c0_19, %c0_20] : memref<8x16xf32, #tpu.memory_space<vmem>>, vector<8x16xf32>
    tpu.vector_store %arg8[%c0_19, %c0_20], %25 {strides = array<i32>} : memref<8x16xf32, #tpu.memory_space<vmem>>, vector<8x16xf32>,
    return
  }
  func.func @transform_0(%arg0: i32) -> (i32, i32) {
    %c0_i32 = arith.constant 0 : i32
    %c0_i32_0 = arith.constant 0 : i32
    return %arg0, %c0_i32 : i32, i32
  }
  func.func @transform_1(%arg0: i32) -> (i32, i32) {
    %c0_i32 = arith.constant 0 : i32
    %c0_i32_0 = arith.constant 0 : i32
    %c0_i32_1 = arith.constant 0 : i32
    return %c0_i32, %c0_i32_0 : i32, i32
  }
  func.func @transform_2(%arg0: i32) -> (i32, i32) {
    %c0_i32 = arith.constant 0 : i32
    %c0_i32_0 = arith.constant 0 : i32
    %c0_i32_1 = arith.constant 0 : i32
    return %c0_i32, %c0_i32_0 : i32, i32
  }
  func.func @transform_3(%arg0: i32) -> (i32, i32) {
    %c0_i32 = arith.constant 0 : i32
    %c0_i32_0 = arith.constant 0 : i32
    %c0_i32_1 = arith.constant 0 : i32
    return %c0_i32, %c0_i32_0 : i32, i32
  }
  func.func @transform_4(%arg0: i32) -> (i32, i32) {
    %c0_i32 = arith.constant 0 : i32
    %c0_i32_0 = arith.constant 0 : i32
    %c0_i32_1 = arith.constant 0 : i32
    return %c0_i32, %c0_i32_0 : i32, i32
  }
  func.func @transform_5(%arg0: i32) -> (i32, i32) {
    %c0_i32 = arith.constant 0 : i32
    %c0_i32_0 = arith.constant 0 : i32
    %c0_i32_1 = arith.constant 0 : i32
    return %c0_i32, %c0_i32_0 : i32, i32
  }
  func.func @transform_6(%arg0: i32) -> (i32, i32) {
    %c0_i32 = arith.constant 0 : i32
    %c0_i32_0 = arith.constant 0 : i32
    %c0_i32_1 = arith.constant 0 : i32
    return %c0_i32, %c0_i32_0 : i32, i32
  }
  func.func @transform_7(%arg0: i32) -> (i32, i32) {
    %c0_i32 = arith.constant 0 : i32
    %c0_i32_0 = arith.constant 0 : i32
    return %arg0, %c0_i32 : i32, i32
  }
}

</mosaic_0001>

<bundles_post_ra>
// kernel: tpu_custom_call.1
= control target key start
LH: loop header
LB: loop body
LE: loop exit
PB: predicated region body
PF: predicated region fallthrough
CT: control target
= control target key end

     0   :  { %12 = vsyncpa [#allocation3], 0  ;;  %s3269_s0 = inlined_call_operand.hbm [shape: f32[8,128], index: 0, kind: input, shape index: {}]   ;;  %s3270_s1 = inlined_call_operand.hbm [shape: f32[128,1024], index: 1, kind: input, shape index: {}]   ;;  %s3271_s2 = inlined_call_operand.hbm [shape: f32[1,1024], index: 2, kind: input, shape index: {}]   ;;  %s3272_s3 = inlined_call_operand.hbm [shape: f32[1024,512], index: 3, kind: input, shape index: {}]   ;;  %s3273_s4 = inlined_call_operand.hbm [shape: f32[1,512], index: 4, kind: input, shape index: {}]   ;;  %s3274_s5 = inlined_call_operand.vmem [shape: f32[512,16], index: 5, kind: input, shape index: {}]   ;;  %s3275_s6 = inlined_call_operand.hbm [shape: f32[1,16], index: 6, kind: input, shape index: {}]   ;;  %s3276_s7 = inlined_call_operand.hbm [shape: f32[8,16], index: 7, kind: output, shape index: {}]  }
   0x1   :  { %13 = vsyncpa [#allocation6], 0 }
   0x2   :  { %14 = vsyncpa [#allocation9], 0 }
   0x3   :  { %15 = vsyncpa [#allocation12], 0 }
   0x4   :  { %16 = vsyncpa [#allocation4], 0  ;;  %s2878_s24 = smov [#allocation5]   ;;  %s2714_s28 = scalar_lea.hbm %s3270_s1, 16384 }
   0x5   :  { %s32_s25 = sshll.u32 %s2878_s24, 4  ;;  %p2715_p0 = scmp.ne.s32.totalorder %s3270_s1, %s2714_s28  ;;  %s33_s25 = int_to_ptr.vmem [resolvable:$true] %s32_s25 }
   0x6   :  { %p2718_p1 = scmp.lt.u32.totalorder %s2714_s28, %s3270_s1 }
   0x8   :  { %p2720_p2 = pnand %p2718_p1, %p2715_p0 }
   0xa   :  { %2723 = shalt.err (!%p2720_p2)
}
   0xb   :  { %s2724_s10 = scalar_lea.vmem %s33_s25, 16384  ;;  %p2729_p4 = scmp.lt.s32.totalorder %s33_s25, %s33_s25 }
   0xc   :  { %p2725_p3 = scmp.ne.s32.totalorder %s33_s25, %s2724_s10  ;;  %p2730_p5 = scmp.lt.s32.totalorder %s2724_s10, %s2724_s10 }
   0xe   :  { %p2731_p6 = por %p2730_p5, %p2729_p4 }
  0x10   :  { %p2732_p7 = pnand %p2731_p6, %p2725_p3 }
  0x12   :  { %2735 = shalt.err (!%p2732_p7)
}
  0x13   :  { %s2879_s11 = smov 1024   ;;  %s2880_s12 = smov 64  }
  0x14   :  { %38 = dma.hbm_to_vmem [thread:$0]  %s3270_s1, 16384, %s33_s25, [#allocation6], %s2879_s11, %s2879_s11, %s2880_s12  }
  0x15   :  { %s2881_s15 = smov [#allocation8]   ;;  %s2736_s19 = scalar_lea.hbm %s3272_s3, 65536 }
  0x16   :  { %s54_s16 = sshll.u32 %s2881_s15, 4  ;;  %p2737_p8 = scmp.ne.s32.totalorder %s3272_s3, %s2736_s19  ;;  %s55_s16 = int_to_ptr.vmem [resolvable:$true] %s54_s16 }
  0x17   :  { %p2740_p9 = scmp.lt.u32.totalorder %s2736_s19, %s3272_s3 }
  0x19   :  { %p2742_p10 = pnand %p2740_p9, %p2737_p8 }
  0x1b   :  { %2745 = shalt.err (!%p2742_p10)
}
  0x1c   :  { %s2746_s24 = scalar_lea.vmem %s55_s16, 65536  ;;  %p2751_p12 = scmp.lt.s32.totalorder %s55_s16, %s55_s16 }
  0x1d   :  { %p2747_p11 = scmp.ne.s32.totalorder %s55_s16, %s2746_s24  ;;  %p2752_p13 = scmp.lt.s32.totalorder %s2746_s24, %s2746_s24 }
  0x1f   :  { %p2753_p0 = por %p2752_p13, %p2751_p12 }
  0x21   :  { %p2754_p1 = pnand %p2753_p0, %p2747_p11 }
  0x23   :  { %2757 = shalt.err (!%p2754_p1)
}
  0x24   :  { %s2882_s1 = smov 512   ;;  %s2883_s25 = smov 32  }
  0x25   :  { %60 = dma.hbm_to_vmem [thread:$0]  %s3272_s3, 65536, %s55_s16, [#allocation9], %s2882_s1, %s2882_s1, %s2883_s25  }
  0x26   :  { %s2884_s28 = smov [#allocation2]   ;;  %s2885_s30 = smov [#allocation7]  }
  0x27   :  { %s23_s29 = sshll.u32 %s2884_s28, 4  ;;  %s45_s8 = sshll.u32 %s2885_s30, 4  ;;  %s24_s29 = int_to_ptr.vmem [resolvable:$true] %s23_s29  ;;  %s46_s8 = int_to_ptr.vmem [resolvable:$true] %s45_s8 }
  0x28   :  { %s2758_s11 = scalar_lea.hbm %s3269_s0, 128 }
  0x29   :  { %p2759_p2 = scmp.ne.s32.totalorder %s3269_s0, %s2758_s11  ;;  %p2762_p3 = scmp.lt.u32.totalorder %s2758_s11, %s3269_s0 }
  0x2b   :  { %p2764_p4 = pnand %p2762_p3, %p2759_p2 }
  0x2d   :  { %2767 = shalt.err (!%p2764_p4)
}
  0x2e   :  { %s2768_s3 = scalar_lea.vmem %s24_s29, 128  ;;  %p2773_p6 = scmp.lt.s32.totalorder %s24_s29, %s24_s29 }
  0x2f   :  { %p2769_p5 = scmp.ne.s32.totalorder %s24_s29, %s2768_s3  ;;  %p2774_p7 = scmp.lt.s32.totalorder %s2768_s3, %s2768_s3 }
  0x31   :  { %p2775_p8 = por %p2774_p7, %p2773_p6 }
  0x33   :  { %p2776_p9 = pnand %p2775_p8, %p2769_p5 }
  0x35   :  { %2779 = shalt.err (!%p2776_p9)
}
  0x36   :  { %26 = dma.hbm_to_vmem [thread:$0]  %s3269_s0, 128, %s24_s29, [#allocation3]  }
  0x37   :  { %s2780_s20 = scalar_lea.hbm %s3271_s2, 128 }
  0x38   :  { %p2781_p10 = scmp.ne.s32.totalorder %s3271_s2, %s2780_s20  ;;  %p2784_p11 = scmp.lt.u32.totalorder %s2780_s20, %s3271_s2 }
  0x3a   :  { %p2786_p12 = pnand %p2784_p11, %p2781_p10 }
  0x3c   :  { %2789 = shalt.err (!%p2786_p12)
}
  0x3d   :  { %s2790_s1 = scalar_lea.vmem %s46_s8, 128  ;;  %p2795_p0 = scmp.lt.s32.totalorder %s46_s8, %s46_s8 }
  0x3e   :  { %p2791_p13 = scmp.ne.s32.totalorder %s46_s8, %s2790_s1  ;;  %p2796_p1 = scmp.lt.s32.totalorder %s2790_s1, %s2790_s1 }
  0x40   :  { %p2797_p2 = por %p2796_p1, %p2795_p0 }
  0x42   :  { %p2798_p3 = pnand %p2797_p2, %p2791_p13 }
  0x44   :  { %2801 = shalt.err (!%p2798_p3)
}
  0x45   :  { %48 = dma.hbm_to_vmem [thread:$0]  %s3271_s2, 128, %s46_s8, [#allocation6]  }
  0x46   :  { %s2886_s26 = smov [#allocation10]   ;;  %s2887_s28 = smov [#allocation11]  }
  0x47   :  { %s67_s27 = sshll.u32 %s2886_s26, 4  ;;  %s79_s29 = sshll.u32 %s2887_s28, 4  ;;  %s68_s27 = int_to_ptr.vmem [resolvable:$true] %s67_s27  ;;  %s80_s29 = int_to_ptr.vmem [resolvable:$true] %s79_s29 }
  0x48   :  { %s2802_s10 = scalar_lea.hbm %s3273_s4, 64 }
  0x49   :  { %p2803_p4 = scmp.ne.s32.totalorder %s3273_s4, %s2802_s10  ;;  %p2806_p5 = scmp.lt.u32.totalorder %s2802_s10, %s3273_s4 }
  0x4b   :  { %p2808_p6 = pnand %p2806_p5, %p2803_p4 }
  0x4d   :  { %2811 = shalt.err (!%p2808_p6)
}
  0x4e   :  { %s2812_s2 = scalar_lea.vmem %s68_s27, 64  ;;  %p2817_p8 = scmp.lt.s32.totalorder %s68_s27, %s68_s27 }
  0x4f   :  { %p2813_p7 = scmp.ne.s32.totalorder %s68_s27, %s2812_s2  ;;  %p2818_p9 = scmp.lt.s32.totalorder %s2812_s2, %s2812_s2 }
  0x51   :  { %p2819_p10 = por %p2818_p9, %p2817_p8 }
  0x53   :  { %p2820_p11 = pnand %p2819_p10, %p2813_p7 }
  0x55   :  { %2823 = shalt.err (!%p2820_p11)
}
  0x56   :  { %70 = dma.hbm_to_vmem [thread:$0]  %s3273_s4, 64, %s68_s27, [#allocation9]  }
  0x57   :  { %s2824_s17 = scalar_lea.hbm %s3275_s6, 16 }
  0x58   :  { %p2825_p12 = scmp.ne.s32.totalorder %s3275_s6, %s2824_s17  ;;  %p2828_p13 = scmp.lt.u32.totalorder %s2824_s17, %s3275_s6 }
  0x5a   :  { %p2830_p0 = pnand %p2828_p13, %p2825_p12 }
  0x5c   :  { %2833 = shalt.err (!%p2830_p0)
}
  0x5d   :  { %s2834_s22 = scalar_lea.vmem %s80_s29, 16  ;;  %s2838_s23 = scalar_lea.vmem %s80_s29, 32 }
  0x5e   :  { %p2835_p1 = scmp.ne.s32.totalorder %s80_s29, %s2834_s22  ;;  %p2839_p2 = scmp.lt.s32.totalorder %s80_s29, %s80_s29 }
  0x5f   :  { %p2840_p3 = scmp.lt.s32.totalorder %s2838_s23, %s2834_s22 }
  0x61   :  { %p2841_p4 = por %p2840_p3, %p2839_p2 }
  0x63   :  { %p2842_p5 = pnand %p2841_p4, %p2835_p1 }
  0x65   :  { %2845 = shalt.err (!%p2842_p5)
}
  0x66   :  { %82 = dma.hbm_to_vmem [thread:$0]  %s3275_s6, 16, %s80_s29, [#allocation12]  }
  0x67   :  { %2868 = dma.done.wait [#allocation3], 128  }
  0x68   :  { %2869 = vsyncadd [#allocation3], 4294967168 }
  0x69   :  { %2870 = dma.done.wait [#allocation6], 16512  }
  0x6a   :  { %2871 = vsyncadd [#allocation6], 4294950784 }
  0x6b   :  { %2872 = dma.done.wait [#allocation9], 65600  }
  0x6c   :  { %2873 = vsyncadd [#allocation9], 4294901696 }
  0x6d   :  { %2874 = dma.done.wait [#allocation12], 16  }
  0x6e   :  { %2875 = vsyncadd [#allocation12], 4294967280  ;;  %v2888_v0 = vmov 0.0   ;;  %v102_v1 = vld [vmem:[#allocation5 + $0x8] sm:$0xff]  ;;  %v101_v3 = vld [vmem:[#allocation5] sm:$0xff]  ;;  %vm1886_vm0 = vcmask 130048  }
  0x6f   :  { %336 = vmatprep.mubr.f32.mxu0 %v2888_v0  ;;  %407 = vmatprep.mubr.f32.mxu1 %v2888_v0  ;;  %v110_v2 = vld [vmem:[#allocation5 + $0x48] sm:$0xff]  ;;  %v109_v5 = vld [vmem:[#allocation5 + $0x40] sm:$0xff]  ;;  %v104_v28 = vld [vmem:[#allocation5 + $0x18] sm:$0xff] }
  0x70   :  { %v1977_v4 = vpack.c.bf16 %v110_v2, %v102_v1  ;;  %v118_v6 = vld [vmem:[#allocation5 + $0x88] sm:$0xff]  ;;  %v1979_v8 = vpack.c.bf16 %v109_v5, %v101_v3  ;;  %v117_v10 = vld [vmem:[#allocation5 + $0x80] sm:$0xff]  ;;  %v112_v29 = vld [vmem:[#allocation5 + $0x58] sm:$0xff] }
  0x71   :  { %v126_v7 = vld [vmem:[#allocation5 + $0xc8] sm:$0xff]  ;;  %v125_v11 = vld [vmem:[#allocation5 + $0xc0] sm:$0xff]  ;;  %v103_v30 = vld [vmem:[#allocation5 + $0x10] sm:$0xff]  ;;  %v2009_v32 = vpack.c.bf16 %v112_v29, %v104_v28 }
  0x72   :  { %v1981_v9 = vpack.c.bf16 %v126_v7, %v118_v6  ;;  %v134_v12 = vld [vmem:[#allocation5 + $0x108] sm:$0xff]  ;;  %1978 = vmatprep.subr.bf16.mxu0 %v1977_v4  ;;  %v1983_v14 = vpack.c.bf16 %v125_v11, %v117_v10  ;;  %v133_v16 = vld [vmem:[#allocation5 + $0x100] sm:$0xff]  ;;  %v111_v33 = vld [vmem:[#allocation5 + $0x50] sm:$0xff] }
  0x73   :  { %v142_v13 = vld [vmem:[#allocation5 + $0x148] sm:$0xff]  ;;  %1980 = vmatpush1.bf16.msra.mxu0 %v1979_v8  ;;  %v141_v17 = vld [vmem:[#allocation5 + $0x140] sm:$0xff]  ;;  %v120_v34 = vld [vmem:[#allocation5 + $0x98] sm:$0xff]  ;;  %v2011_v37 = vpack.c.bf16 %v111_v33, %v103_v30  ;;  %2010 = vmatprep.subr.bf16.mxu1 %v2009_v32 }
  0x74   :  { %1982 = vmatprep.subr.bf16.mxu0 %v1981_v9  ;;  %v1985_v15 = vpack.c.bf16 %v142_v13, %v134_v12  ;;  %v150_v18 = vld [vmem:[#allocation5 + $0x188] sm:$0xff]  ;;  %v1987_v20 = vpack.c.bf16 %v141_v17, %v133_v16  ;;  %v149_v22 = vld [vmem:[#allocation5 + $0x180] sm:$0xff]  ;;  %v128_v35 = vld [vmem:[#allocation5 + $0xd8] sm:$0xff] }
  0x75   :  { %v158_v19 = vld [vmem:[#allocation5 + $0x1c8] sm:$0xff]  ;;  %v157_v23 = vld [vmem:[#allocation5 + $0x1c0] sm:$0xff]  ;;  %v2013_v38 = vpack.c.bf16 %v128_v35, %v120_v34  ;;  %v119_v39 = vld [vmem:[#allocation5 + $0x90] sm:$0xff]  ;;  %2012 = vmatpush1.bf16.msra.mxu1 %v2011_v37 }
  0x76   :  { %v1989_v21 = vpack.c.bf16 %v158_v19, %v150_v18  ;;  %v166_v24 = vld [vmem:[#allocation5 + $0x208] sm:$0xff]  ;;  %v165_v26 = vld [vmem:[#allocation5 + $0x200] sm:$0xff]  ;;  %v1991_v31 = vpack.c.bf16 %v157_v23, %v149_v22  ;;  %v127_v40 = vld [vmem:[#allocation5 + $0xd0] sm:$0xff] }
  0x77   :  { %1984 = vmatpush1.bf16.msra.mxu0 %v1983_v14  ;;  %v174_v25 = vld [vmem:[#allocation5 + $0x248] sm:$0xff]  ;;  %v173_v27 = vld [vmem:[#allocation5 + $0x240] sm:$0xff]  ;;  %v136_v41 = vld [vmem:[#allocation5 + $0x118] sm:$0xff]  ;;  %v2015_v45 = vpack.c.bf16 %v127_v40, %v119_v39  ;;  %2014 = vmatprep.subr.bf16.mxu1 %v2013_v38 }
  0x78   :  { %1986 = vmatprep.subr.bf16.mxu0 %v1985_v15  ;;  %v1993_v36 = vpack.c.bf16 %v174_v25, %v166_v24  ;;  %v182_v42 = vld [vmem:[#allocation5 + $0x288] sm:$0xff]  ;;  %v144_v44 = vld [vmem:[#allocation5 + $0x158] sm:$0xff]  ;;  %v1995_v46 = vpack.c.bf16 %v173_v27, %v165_v26  ;;  %v181_v47 = vld [vmem:[#allocation5 + $0x280] sm:$0xff] }
  0x79   :  { %v190_v43 = vld [vmem:[#allocation5 + $0x2c8] sm:$0xff]  ;;  %v2017_v48 = vpack.c.bf16 %v144_v44, %v136_v41  ;;  %v135_v49 = vld [vmem:[#allocation5 + $0x110] sm:$0xff]  ;;  %v189_v52 = vld [vmem:[#allocation5 + $0x2c0] sm:$0xff]  ;;  %2016 = vmatpush1.bf16.msra.mxu1 %v2015_v45 }
  0x7a   :  { %v143_v50 = vld [vmem:[#allocation5 + $0x150] sm:$0xff]  ;;  %v1997_v51 = vpack.c.bf16 %v190_v43, %v182_v42  ;;  %v152_v53 = vld [vmem:[#allocation5 + $0x198] sm:$0xff]  ;;  %v198_v55 = vld [vmem:[#allocation5 + $0x308] sm:$0xff]  ;;  %v1999_v58 = vpack.c.bf16 %v189_v52, %v181_v47 }
  0x7b   :  { %1988 = vmatpush1.bf16.msra.mxu0 %v1987_v20  ;;  %v160_v54 = vld [vmem:[#allocation5 + $0x1d8] sm:$0xff]  ;;  %v206_v56 = vld [vmem:[#allocation5 + $0x348] sm:$0xff]  ;;  %v2019_v57 = vpack.c.bf16 %v143_v50, %v135_v49  ;;  %v197_v59 = vld [vmem:[#allocation5 + $0x300] sm:$0xff]  ;;  %2018 = vmatprep.subr.bf16.mxu1 %v2017_v48 }
  0x7c   :  { %1990 = vmatprep.subr.bf16.mxu0 %v1989_v21  ;;  %v2021_v60 = vpack.c.bf16 %v160_v54, %v152_v53  ;;  %v151_v61 = vld [vmem:[#allocation5 + $0x190] sm:$0xff]  ;;  %v2001_v63 = vpack.c.bf16 %v206_v56, %v198_v55  ;;  %v205_v1 = vld [vmem:[#allocation5 + $0x340] sm:$0xff]  ;;  %v168_v2 = vld [vmem:[#allocation5 + $0x218] sm:$0xff] }
  0x7d   :  { %v159_v62 = vld [vmem:[#allocation5 + $0x1d0] sm:$0xff]  ;;  %v176_v3 = vld [vmem:[#allocation5 + $0x258] sm:$0xff]  ;;  %v214_v4 = vld [vmem:[#allocation5 + $0x388] sm:$0xff]  ;;  %2020 = vmatpush1.bf16.msra.mxu1 %v2019_v57  ;;  %v2003_v7 = vpack.c.bf16 %v205_v1, %v197_v59 }
  0x7e   :  { %v222_v5 = vld [vmem:[#allocation5 + $0x3c8] sm:$0xff]  ;;  %v2023_v6 = vpack.c.bf16 %v159_v62, %v151_v61  ;;  %v213_v8 = vld [vmem:[#allocation5 + $0x380] sm:$0xff]  ;;  %2022 = vmatprep.subr.bf16.mxu1 %v2021_v60  ;;  %v2025_v9 = vpack.c.bf16 %v176_v3, %v168_v2  ;;  %v167_v10 = vld [vmem:[#allocation5 + $0x210] sm:$0xff] }
  0x7f   :  { %1992 = vmatpush1.bf16.msra.mxu0 %v1991_v31  ;;  %v175_v11 = vld [vmem:[#allocation5 + $0x250] sm:$0xff]  ;;  %v2005_v12 = vpack.c.bf16 %v222_v5, %v214_v4  ;;  %v221_v13 = vld [vmem:[#allocation5 + $0x3c0] sm:$0xff]  ;;  %v184_v14 = vld [vmem:[#allocation5 + $0x298] sm:$0xff] }
  0x80   :  { %1994 = vmatprep.subr.bf16.mxu0 %v1993_v36  ;;  %v192_v15 = vld [vmem:[#allocation5 + $0x2d8] sm:$0xff]  ;;  %v106_v16 = vld [vmem:[#allocation5 + $0x28] sm:$0xff]  ;;  %v2027_v18 = vpack.c.bf16 %v175_v11, %v167_v10  ;;  %v2007_v19 = vpack.c.bf16 %v221_v13, %v213_v8  ;;  %v183_v21 = vld [vmem:[#allocation5 + $0x290] sm:$0xff] }
  0x81   :  { %v114_v17 = vld [vmem:[#allocation5 + $0x68] sm:$0xff]  ;;  %2024 = vmatpush1.bf16.msra.mxu1 %v2023_v6  ;;  %v2029_v20 = vpack.c.bf16 %v192_v15, %v184_v14  ;;  %v191_v22 = vld [vmem:[#allocation5 + $0x2d0] sm:$0xff]  ;;  %v200_v23 = vld [vmem:[#allocation5 + $0x318] sm:$0xff] }
  0x82   :  { %2026 = vmatprep.subr.bf16.mxu1 %v2025_v9  ;;  %v208_v24 = vld [vmem:[#allocation5 + $0x358] sm:$0xff]  ;;  %v2041_v25 = vpack.c.bf16 %v114_v17, %v106_v16  ;;  %v105_v26 = vld [vmem:[#allocation5 + $0x20] sm:$0xff]  ;;  %v122_v28 = vld [vmem:[#allocation5 + $0xa8] sm:$0xff]  ;;  %v2031_v31 = vpack.c.bf16 %v191_v22, %v183_v21 }
  0x83   :  { %1996 = vmatpush1.bf16.msra.mxu0 %v1995_v46  ;;  %v113_v27 = vld [vmem:[#allocation5 + $0x60] sm:$0xff]  ;;  %v130_v29 = vld [vmem:[#allocation5 + $0xe8] sm:$0xff]  ;;  %v3004_v30 = vld [vmem:[#allocation2] sm:$0xff]  ;;  %v2033_v32 = vpack.c.bf16 %v208_v24, %v200_v23 }
  0x84   :  { %1998 = vmatprep.subr.bf16.mxu0 %v1997_v51  ;;  %v199_v33 = vld [vmem:[#allocation5 + $0x310] sm:$0xff]  ;;  %v216_v35 = vld [vmem:[#allocation5 + $0x398] sm:$0xff]  ;;  %v2043_v36 = vpack.c.bf16 %v113_v27, %v105_v26  ;;  %v2045_v38 = vpack.c.bf16 %v130_v29, %v122_v28  ;;  %v121_v39 = vld [vmem:[#allocation5 + $0xa0] sm:$0xff] }
  0x85   :  { %2028 = vmatpush1.bf16.msra.mxu1 %v2027_v18  ;;  %v207_v34 = vld [vmem:[#allocation5 + $0x350] sm:$0xff]  ;;  %v224_v37 = vld [vmem:[#allocation5 + $0x3d8] sm:$0xff]  ;;  %v129_v40 = vld [vmem:[#allocation5 + $0xe0] sm:$0xff] }
  0x86   :  { %2030 = vmatprep.subr.bf16.mxu1 %v2029_v20  ;;  %v138_v41 = vld [vmem:[#allocation5 + $0x128] sm:$0xff]  ;;  %v2035_v43 = vpack.c.bf16 %v207_v34, %v199_v33  ;;  %v2037_v44 = vpack.c.bf16 %v224_v37, %v216_v35  ;;  %v215_v45 = vld [vmem:[#allocation5 + $0x390] sm:$0xff]  ;;  %v2047_v47 = vpack.c.bf16 %v129_v40, %v121_v39  ;;  %v137_v48 = vld [vmem:[#allocation5 + $0x120] sm:$0xff] }
  0x87   :  { %2000 = vmatpush1.bf16.msra.mxu0 %v1999_v58  ;;  %v146_v42 = vld [vmem:[#allocation5 + $0x168] sm:$0xff]  ;;  %v223_v46 = vld [vmem:[#allocation5 + $0x3d0] sm:$0xff]  ;;  %v145_v50 = vld [vmem:[#allocation5 + $0x160] sm:$0xff] }
  0x88   :  { %2002 = vmatprep.subr.bf16.mxu0 %v2001_v63  ;;  %v2049_v49 = vpack.c.bf16 %v146_v42, %v138_v41  ;;  %v108_v51 = vld [vmem:[#allocation5 + $0x38] sm:$0xff]  ;;  %v154_v53 = vld [vmem:[#allocation5 + $0x1a8] sm:$0xff]  ;;  %v2039_v55 = vpack.c.bf16 %v223_v46, %v215_v45  ;;  %v2051_v56 = vpack.c.bf16 %v145_v50, %v137_v48  ;;  %v153_v57 = vld [vmem:[#allocation5 + $0x1a0] sm:$0xff] }
  0x89   :  { %2032 = vmatpush1.bf16.msra.mxu1 %v2031_v31  ;;  %v116_v52 = vld [vmem:[#allocation5 + $0x78] sm:$0xff]  ;;  %v162_v54 = vld [vmem:[#allocation5 + $0x1e8] sm:$0xff]  ;;  %v107_v59 = vld [vmem:[#allocation5 + $0x30] sm:$0xff] }
  0x8a   :  { %2034 = vmatprep.subr.bf16.mxu1 %v2033_v32  ;;  %v2073_v58 = vpack.c.bf16 %v116_v52, %v108_v51  ;;  %v115_v60 = vld [vmem:[#allocation5 + $0x70] sm:$0xff]  ;;  %v2053_v61 = vpack.c.bf16 %v162_v54, %v154_v53  ;;  %v161_v62 = vld [vmem:[#allocation5 + $0x1e0] sm:$0xff]  ;;  %v124_v63 = vld [vmem:[#allocation5 + $0xb8] sm:$0xff] }
  0x8b   :  { %2004 = vmatpush1.bf16.msra.mxu0 %v2003_v7  ;;  %v132_v1 = vld [vmem:[#allocation5 + $0xf8] sm:$0xff]  ;;  %v170_v2 = vld [vmem:[#allocation5 + $0x228] sm:$0xff]  ;;  %v2075_v4 = vpack.c.bf16 %v115_v60, %v107_v59  ;;  %v2055_v5 = vpack.c.bf16 %v161_v62, %v153_v57  ;;  %v169_v6 = vld [vmem:[#allocation5 + $0x220] sm:$0xff] }
  0x8c   :  { %2006 = vmatprep.subr.bf16.mxu0 %v2005_v12  ;;  %v178_v3 = vld [vmem:[#allocation5 + $0x268] sm:$0xff]  ;;  %v2077_v7 = vpack.c.bf16 %v132_v1, %v124_v63  ;;  %v123_v8 = vld [vmem:[#allocation5 + $0xb0] sm:$0xff]  ;;  %v177_v11 = vld [vmem:[#allocation5 + $0x260] sm:$0xff] }
  0x8d   :  { %2036 = vmatpush1.bf16.msra.mxu1 %v2035_v43  ;;  %v131_v9 = vld [vmem:[#allocation5 + $0xf0] sm:$0xff]  ;;  %v2057_v10 = vpack.c.bf16 %v178_v3, %v170_v2  ;;  %v140_v12 = vld [vmem:[#allocation5 + $0x138] sm:$0xff]  ;;  %v186_v14 = vld [vmem:[#allocation5 + $0x2a8] sm:$0xff]  ;;  %v2059_v17 = vpack.c.bf16 %v177_v11, %v169_v6 }
  0x8e   :  { %2038 = vmatprep.subr.bf16.mxu1 %v2037_v44  ;;  %v148_v13 = vld [vmem:[#allocation5 + $0x178] sm:$0xff]  ;;  %v194_v15 = vld [vmem:[#allocation5 + $0x2e8] sm:$0xff]  ;;  %v2079_v16 = vpack.c.bf16 %v131_v9, %v123_v8  ;;  %v185_v18 = vld [vmem:[#allocation5 + $0x2a0] sm:$0xff] }
  0x8f   :  { %2008 = vmatpush1.bf16.msra.mxu0 %v2007_v19  ;;  %v2081_v19 = vpack.c.bf16 %v148_v13, %v140_v12  ;;  %v139_v20 = vld [vmem:[#allocation5 + $0x130] sm:$0xff]  ;;  %v2061_v22 = vpack.c.bf16 %v194_v15, %v186_v14  ;;  %v193_v23 = vld [vmem:[#allocation5 + $0x2e0] sm:$0xff]  ;;  %v156_v24 = vld [vmem:[#allocation5 + $0x1b8] sm:$0xff] }
  0x90   :  { %2042 = vmatprep.subr.bf16.mxu0 %v2041_v25  ;;  %v147_v21 = vld [vmem:[#allocation5 + $0x170] sm:$0xff]  ;;  %v164_v25 = vld [vmem:[#allocation5 + $0x1f8] sm:$0xff]  ;;  %v202_v26 = vld [vmem:[#allocation5 + $0x328] sm:$0xff]  ;;  %v2063_v29 = vpack.c.bf16 %v193_v23, %v185_v18 }
  0x91   :  { %2040 = vmatpush1.bf16.msra.mxu1 %v2039_v55  ;;  %v210_v27 = vld [vmem:[#allocation5 + $0x368] sm:$0xff]  ;;  %v2083_v28 = vpack.c.bf16 %v147_v21, %v139_v20  ;;  %v201_v31 = vld [vmem:[#allocation5 + $0x320] sm:$0xff]  ;;  %v155_v32 = vld [vmem:[#allocation5 + $0x1b0] sm:$0xff] }
  0x92   :  { %337 = vmatmul.mubr.f32.vlgmr.msra.gmra.mrb[0].mxu0 %v3004_v30  ;;  %2074 = vmatprep.subr.bf16.mxu1 %v2073_v58  ;;  %v163_v33 = vld [vmem:[#allocation5 + $0x1f0] sm:$0xff]  ;;  %v2065_v34 = vpack.c.bf16 %v210_v27, %v202_v26  ;;  %v209_v35 = vld [vmem:[#allocation5 + $0x360] sm:$0xff]  ;;  %v180_v37 = vld [vmem:[#allocation5 + $0x278] sm:$0xff] }
  0x93   :  { %2044 = vmatpush1.bf16.msra.mxu0 %v2043_v36  ;;  %478 = vmatprep.mubr.f32.mxu0 %v2888_v0  ;;  %v172_v36 = vld [vmem:[#allocation5 + $0x238] sm:$0xff]  ;;  %v226_v39 = vld [vmem:[#allocation5 + $0x3e8] sm:$0xff]  ;;  %v2087_v40 = vpack.c.bf16 %v163_v33, %v155_v32  ;;  %v2067_v41 = vpack.c.bf16 %v209_v35, %v201_v31  ;;  %v217_v42 = vld [vmem:[#allocation5 + $0x3a0] sm:$0xff] }
  0x94   :  { %2046 = vmatprep.subr.bf16.mxu0 %v2045_v38  ;;  %408 = vmatmul.mubr.f32.vlgmr.msra.gmra.mrb[0].mxu1 %v3004_v30  ;;  %v218_v38 = vld [vmem:[#allocation5 + $0x3a8] sm:$0xff]  ;;  %v2089_v43 = vpack.c.bf16 %v180_v37, %v172_v36  ;;  %v171_v44 = vld [vmem:[#allocation5 + $0x230] sm:$0xff]  ;;  %v188_v48 = vld [vmem:[#allocation5 + $0x2b8] sm:$0xff] }
  0x95   :  { %2076 = vmatpush1.bf16.msra.mxu1 %v2075_v4  ;;  %549 = vmatprep.mubr.f32.mxu1 %v2888_v0  ;;  %v2085_v0 = vpack.c.bf16 %v164_v25, %v156_v24  ;;  %v179_v45 = vld [vmem:[#allocation5 + $0x270] sm:$0xff]  ;;  %v2069_v46 = vpack.c.bf16 %v226_v39, %v218_v38  ;;  %v204_v57 = vld [vmem:[#allocation5 + $0x338] sm:$0xff]  ;;  %v564_v60 = vld [vmem:[#allocation8] sm:$0xff] }
  0x96   :  { %2078 = vmatprep.subr.bf16.mxu1 %v2077_v7  ;;  %v565_v50 = vld [vmem:[#allocation8 + $0x8] sm:$0xff]  ;;  %v2091_v52 = vpack.c.bf16 %v179_v45, %v171_v44  ;;  %v212_v58 = vld [vmem:[#allocation5 + $0x378] sm:$0xff]  ;;  %v572_v9 = vld [vmem:[#allocation8 + $0x40] sm:$0xff] }
  0x97   :  { %2048 = vmatpush1.bf16.msra.mxu0 %v2047_v47  ;;  %v225_v47 = vld [vmem:[#allocation5 + $0x3e0] sm:$0xff]  ;;  %v569_v51 = vld [vmem:[#allocation8 + $0x28] sm:$0xff]  ;;  %v2097_v2 = vpack.c.bf16 %v212_v58, %v204_v57  ;;  %v228_v7 = vld [vmem:[#allocation5 + $0x3f8] sm:$0xff] }
  0x98   :  { %2050 = vmatprep.subr.bf16.mxu0 %v2049_v49  ;;  %v196_v49 = vld [vmem:[#allocation5 + $0x2f8] sm:$0xff]  ;;  %v2071_v53 = vpack.c.bf16 %v225_v47, %v217_v42  ;;  %v187_v55 = vld [vmem:[#allocation5 + $0x2b0] sm:$0xff]  ;;  %v2105_v59 = vpack.c.bf16 %v569_v51, %v565_v50  ;;  %v580_v21 = vld [vmem:[#allocation8 + $0x80] sm:$0xff] }
  0x99   :  { %2080 = vmatpush1.bf16.msra.mxu1 %v2079_v16  ;;  %v2093_v54 = vpack.c.bf16 %v196_v49, %v188_v48  ;;  %v573_v62 = vld [vmem:[#allocation8 + $0x48] sm:$0xff]  ;;  %v566_v27 = vld [vmem:[#allocation8 + $0x10] sm:$0xff]  ;;  %v588_v33 = vld [vmem:[#allocation8 + $0xc0] sm:$0xff] }
  0x9a   :  { %2082 = vmatprep.subr.bf16.mxu1 %v2081_v19  ;;  %v577_v63 = vld [vmem:[#allocation8 + $0x68] sm:$0xff]  ;;  %v571_v19 = vld [vmem:[#allocation8 + $0x38] sm:$0xff]  ;;  %v574_v39 = vld [vmem:[#allocation8 + $0x50] sm:$0xff] }
  0x9b   :  { %2052 = vmatpush1.bf16.msra.mxu0 %v2051_v56  ;;  %v195_v56 = vld [vmem:[#allocation5 + $0x2f0] sm:$0xff]  ;;  %v2109_v8 = vpack.c.bf16 %v577_v63, %v573_v62  ;;  %v596_v45 = vld [vmem:[#allocation8 + $0x100] sm:$0xff]  ;;  %v582_v51 = vld [vmem:[#allocation8 + $0x90] sm:$0xff] }
  0x9c   :  { %2054 = vmatprep.subr.bf16.mxu0 %v2053_v61  ;;  %v568_v61 = vld [vmem:[#allocation8 + $0x20] sm:$0xff]  ;;  %v2095_v1 = vpack.c.bf16 %v195_v56, %v187_v55  ;;  %v203_v3 = vld [vmem:[#allocation5 + $0x330] sm:$0xff]  ;;  %v595_v55 = vld [vmem:[#allocation8 + $0xf8] sm:$0xff] }
  0x9d   :  { %2084 = vmatpush1.bf16.msra.mxu1 %v2083_v28  ;;  %v211_v4 = vld [vmem:[#allocation5 + $0x370] sm:$0xff]  ;;  %v2107_v6 = vpack.c.bf16 %v568_v61, %v564_v60  ;;  %v570_v28 = vld [vmem:[#allocation8 + $0x30] sm:$0xff]  ;;  %v604_v57 = vld [vmem:[#allocation8 + $0x140] sm:$0xff] }
  0x9e   :  { %2086 = vmatprep.subr.bf16.mxu1 %v2085_v0  ;;  %v581_v11 = vld [vmem:[#allocation8 + $0x88] sm:$0xff]  ;;  %v2099_v13 = vpack.c.bf16 %v211_v4, %v203_v3  ;;  %v579_v0 = vld [vmem:[#allocation8 + $0x78] sm:$0xff]  ;;  %v2363_v37 = vpack.c.bf16 %v570_v28, %v566_v27  ;;  %v608_v58 = vld [vmem:[#allocation8 + $0x160] sm:$0xff] }
  0x9f   :  { %2056 = vmatpush1.bf16.msra.mxu0 %v2055_v5  ;;  %v220_v5 = vld [vmem:[#allocation5 + $0x3b8] sm:$0xff]  ;;  %v585_v12 = vld [vmem:[#allocation8 + $0xa8] sm:$0xff]  ;;  %v603_v3 = vld [vmem:[#allocation8 + $0x138] sm:$0xff] }
  0xa0   :  { %2058 = vmatprep.subr.bf16.mxu0 %v2057_v10  ;;  %v576_v10 = vld [vmem:[#allocation8 + $0x60] sm:$0xff]  ;;  %v2101_v14 = vpack.c.bf16 %v228_v7, %v220_v5  ;;  %v219_v15 = vld [vmem:[#allocation5 + $0x3b0] sm:$0xff]  ;;  %v2113_v20 = vpack.c.bf16 %v585_v12, %v581_v11  ;;  %v590_v62 = vld [vmem:[#allocation8 + $0xd0] sm:$0xff] }
  0xa1   :  { %2088 = vmatpush1.bf16.msra.mxu1 %v2087_v40  ;;  %v227_v16 = vld [vmem:[#allocation5 + $0x3f0] sm:$0xff]  ;;  %v2111_v18 = vpack.c.bf16 %v576_v10, %v572_v9  ;;  %v578_v40 = vld [vmem:[#allocation8 + $0x70] sm:$0xff]  ;;  %v612_v5 = vld [vmem:[#allocation8 + $0x180] sm:$0xff] }
  0xa2   :  { %2090 = vmatprep.subr.bf16.mxu1 %v2089_v43  ;;  %v589_v23 = vld [vmem:[#allocation8 + $0xc8] sm:$0xff]  ;;  %v2103_v25 = vpack.c.bf16 %v227_v16, %v219_v15  ;;  %v587_v43 = vld [vmem:[#allocation8 + $0xb8] sm:$0xff]  ;;  %v2367_v49 = vpack.c.bf16 %v578_v40, %v574_v39  ;;  %v594_v63 = vld [vmem:[#allocation8 + $0xf0] sm:$0xff] }
  0xa3   :  { %2060 = vmatpush1.bf16.msra.mxu0 %v2059_v17  ;;  %v567_v17 = vld [vmem:[#allocation8 + $0x18] sm:$0xff]  ;;  %v593_v24 = vld [vmem:[#allocation8 + $0xe8] sm:$0xff]  ;;  %v2375_v9 = vpack.c.bf16 %v594_v63, %v590_v62  ;;  %v598_v11 = vld [vmem:[#allocation8 + $0x110] sm:$0xff] }
  0xa4   :  { %2062 = vmatprep.subr.bf16.mxu0 %v2061_v22  ;;  %v584_v22 = vld [vmem:[#allocation8 + $0xa0] sm:$0xff]  ;;  %v2361_v26 = vpack.c.bf16 %v571_v19, %v567_v17  ;;  %v2117_v32 = vpack.c.bf16 %v593_v24, %v589_v23  ;;  %v597_v35 = vld [vmem:[#allocation8 + $0x108] sm:$0xff]  ;;  %v602_v12 = vld [vmem:[#allocation8 + $0x130] sm:$0xff] }
  0xa5   :  { %2092 = vmatpush1.bf16.msra.mxu1 %v2091_v52  ;;  %v2115_v31 = vpack.c.bf16 %v584_v22, %v580_v21  ;;  %v601_v36 = vld [vmem:[#allocation8 + $0x128] sm:$0xff]  ;;  %v586_v52 = vld [vmem:[#allocation8 + $0xb0] sm:$0xff]  ;;  %v611_v15 = vld [vmem:[#allocation8 + $0x178] sm:$0xff]  ;;  %v2379_v21 = vpack.c.bf16 %v602_v12, %v598_v11 }
  0xa6   :  { %2094 = vmatprep.subr.bf16.mxu1 %v2093_v54  ;;  %v2121_v44 = vpack.c.bf16 %v601_v36, %v597_v35  ;;  %v605_v47 = vld [vmem:[#allocation8 + $0x148] sm:$0xff]  ;;  %v620_v17 = vld [vmem:[#allocation8 + $0x1c0] sm:$0xff]  ;;  %v606_v23 = vld [vmem:[#allocation8 + $0x150] sm:$0xff] }
  0xa7   :  { %2064 = vmatpush1.bf16.msra.mxu0 %v2063_v29  ;;  %v575_v29 = vld [vmem:[#allocation8 + $0x58] sm:$0xff]  ;;  %v609_v48 = vld [vmem:[#allocation8 + $0x168] sm:$0xff]  ;;  %v610_v24 = vld [vmem:[#allocation8 + $0x170] sm:$0xff] }
  0xa8   :  { %2066 = vmatprep.subr.bf16.mxu0 %v2065_v34  ;;  %v592_v34 = vld [vmem:[#allocation8 + $0xe0] sm:$0xff]  ;;  %v2365_v38 = vpack.c.bf16 %v579_v0, %v575_v29  ;;  %v2125_v56 = vpack.c.bf16 %v609_v48, %v605_v47  ;;  %v617_v60 = vld [vmem:[#allocation8 + $0x1a8] sm:$0xff]  ;;  %v619_v27 = vld [vmem:[#allocation8 + $0x1b8] sm:$0xff] }
  0xa9   :  { %2096 = vmatpush1.bf16.msra.mxu1 %v2095_v1  ;;  %v2119_v42 = vpack.c.bf16 %v592_v34, %v588_v33  ;;  %v599_v1 = vld [vmem:[#allocation8 + $0x118] sm:$0xff]  ;;  %v621_v7 = vld [vmem:[#allocation8 + $0x1c8] sm:$0xff]  ;;  %v628_v29 = vld [vmem:[#allocation8 + $0x200] sm:$0xff]  ;;  %v2383_v33 = vpack.c.bf16 %v610_v24, %v606_v23 }
  0xaa   :  { %2098 = vmatprep.subr.bf16.mxu1 %v2097_v2  ;;  %v2127_v2 = vpack.c.bf16 %v608_v58, %v604_v57  ;;  %v2377_v10 = vpack.c.bf16 %v603_v3, %v599_v1  ;;  %v629_v19 = vld [vmem:[#allocation8 + $0x208] sm:$0xff]  ;;  %v614_v35 = vld [vmem:[#allocation8 + $0x190] sm:$0xff]  ;;  %v627_v39 = vld [vmem:[#allocation8 + $0x1f8] sm:$0xff] }
  0xab   :  { %2068 = vmatpush1.bf16.msra.mxu0 %v2067_v41  ;;  %v583_v41 = vld [vmem:[#allocation8 + $0x98] sm:$0xff]  ;;  %v637_v0 = vld [vmem:[#allocation8 + $0x248] sm:$0xff]  ;;  %v618_v36 = vld [vmem:[#allocation8 + $0x1b0] sm:$0xff] }
  0xac   :  { %2070 = vmatprep.subr.bf16.mxu0 %v2069_v46  ;;  %v600_v46 = vld [vmem:[#allocation8 + $0x120] sm:$0xff]  ;;  %v2369_v50 = vpack.c.bf16 %v587_v43, %v583_v41  ;;  %v645_v43 = vld [vmem:[#allocation8 + $0x288] sm:$0xff]  ;;  %v622_v47 = vld [vmem:[#allocation8 + $0x1d0] sm:$0xff] }
  0xad   :  { %2100 = vmatpush1.bf16.msra.mxu1 %v2099_v13  ;;  %v2123_v54 = vpack.c.bf16 %v600_v46, %v596_v45  ;;  %v607_v13 = vld [vmem:[#allocation8 + $0x158] sm:$0xff]  ;;  %v636_v41 = vld [vmem:[#allocation8 + $0x240] sm:$0xff]  ;;  %v2387_v45 = vpack.c.bf16 %v618_v36, %v614_v35  ;;  %v626_v48 = vld [vmem:[#allocation8 + $0x1f0] sm:$0xff] }
  0xae   :  { %2102 = vmatprep.subr.bf16.mxu1 %v2101_v14  ;;  %v2381_v22 = vpack.c.bf16 %v611_v15, %v607_v13  ;;  %v2391_v57 = vpack.c.bf16 %v626_v48, %v622_v47  ;;  %v643_v62 = vld [vmem:[#allocation8 + $0x278] sm:$0xff]  ;;  %v652_v1 = vld [vmem:[#allocation8 + $0x2c0] sm:$0xff]  ;;  %v661_v3 = vld [vmem:[#allocation8 + $0x308] sm:$0xff] }
  0xaf   :  { %2072 = vmatpush1.bf16.msra.mxu0 %v2071_v53  ;;  %v591_v53 = vld [vmem:[#allocation8 + $0xd8] sm:$0xff]  ;;  %v660_v13 = vld [vmem:[#allocation8 + $0x300] sm:$0xff]  ;;  %v669_v15 = vld [vmem:[#allocation8 + $0x348] sm:$0xff] }
  0xb0   :  { %2106 = vmatprep.subr.bf16.mxu0 %v2105_v59  ;;  %v613_v59 = vld [vmem:[#allocation8 + $0x188] sm:$0xff]  ;;  %v2373_v61 = vpack.c.bf16 %v595_v55, %v591_v53  ;;  %v644_v53 = vld [vmem:[#allocation8 + $0x280] sm:$0xff]  ;;  %v651_v11 = vld [vmem:[#allocation8 + $0x2b8] sm:$0xff] }
  0xb1   :  { %2104 = vmatpush1.bf16.msra.mxu1 %v2103_v25  ;;  %v2129_v4 = vpack.c.bf16 %v617_v60, %v613_v59  ;;  %v615_v25 = vld [vmem:[#allocation8 + $0x198] sm:$0xff]  ;;  %v653_v55 = vld [vmem:[#allocation8 + $0x2c8] sm:$0xff]  ;;  %v630_v59 = vld [vmem:[#allocation8 + $0x210] sm:$0xff] }
  0xb2   :  { %479 = vmatmul.mubr.f32.vlgmr.msra.gmra.mrb[2].mxu0 %v3004_v30  ;;  %2362 = vmatprep.subr.bf16.mxu1 %v2361_v26  ;;  %v2385_v34 = vpack.c.bf16 %v619_v27, %v615_v25  ;;  %v634_v60 = vld [vmem:[#allocation8 + $0x230] sm:$0xff]  ;;  %v659_v23 = vld [vmem:[#allocation8 + $0x2f8] sm:$0xff]  ;;  %v668_v25 = vld [vmem:[#allocation8 + $0x340] sm:$0xff] }
  0xb3   :  { %2108 = vmatpush1.bf16.msra.mxu0 %v2107_v6  ;;  %v616_v6 = vld [vmem:[#allocation8 + $0x1a0] sm:$0xff]  ;;  %v677_v27 = vld [vmem:[#allocation8 + $0x388] sm:$0xff]  ;;  %v667_v35 = vld [vmem:[#allocation8 + $0x338] sm:$0xff] }
  0xb4   :  { %2110 = vmatprep.subr.bf16.mxu0 %v2109_v8  ;;  %550 = vmatmul.mubr.f32.vlgmr.msra.gmra.mrb[2].mxu1 %v3004_v30  ;;  %v2371_v30 = vpack.c.bf16 %v586_v52, %v582_v51  ;;  %v625_v8 = vld [vmem:[#allocation8 + $0x1e8] sm:$0xff]  ;;  %v2131_v14 = vpack.c.bf16 %v616_v6, %v612_v5  ;;  %v635_v51 = vld [vmem:[#allocation8 + $0x238] sm:$0xff]  ;;  %v2395_v5 = vpack.c.bf16 %v634_v60, %v630_v59 }
  0xb5   :  { %2364 = vmatpush1.bf16.msra.mxu1 %v2363_v37  ;;  %v2133_v16 = vpack.c.bf16 %v625_v8, %v621_v7  ;;  %v623_v37 = vld [vmem:[#allocation8 + $0x1d8] sm:$0xff]  ;;  %v638_v7 = vld [vmem:[#allocation8 + $0x250] sm:$0xff] }
  0xb6   :  { %2366 = vmatprep.subr.bf16.mxu1 %v2365_v38  ;;  %v2389_v46 = vpack.c.bf16 %v627_v39, %v623_v37  ;;  %v642_v8 = vld [vmem:[#allocation8 + $0x270] sm:$0xff]  ;;  %v676_v37 = vld [vmem:[#allocation8 + $0x380] sm:$0xff]  ;;  %v685_v39 = vld [vmem:[#allocation8 + $0x3c8] sm:$0xff] }
  0xb7   :  { %2112 = vmatpush1.bf16.msra.mxu0 %v2111_v18  ;;  %v624_v18 = vld [vmem:[#allocation8 + $0x1e0] sm:$0xff]  ;;  %v675_v47 = vld [vmem:[#allocation8 + $0x378] sm:$0xff] }
  0xb8   :  { %2114 = vmatprep.subr.bf16.mxu0 %v2113_v20  ;;  %v633_v20 = vld [vmem:[#allocation8 + $0x228] sm:$0xff]  ;;  %v2135_v26 = vpack.c.bf16 %v624_v18, %v620_v17  ;;  %v2399_v17 = vpack.c.bf16 %v642_v8, %v638_v7  ;;  %v683_v59 = vld [vmem:[#allocation8 + $0x3b8] sm:$0xff] }
  0xb9   :  { %2368 = vmatpush1.bf16.msra.mxu1 %v2367_v49  ;;  %v2137_v28 = vpack.c.bf16 %v633_v20, %v629_v19  ;;  %v631_v49 = vld [vmem:[#allocation8 + $0x218] sm:$0xff]  ;;  %v646_v19 = vld [vmem:[#allocation8 + $0x290] sm:$0xff] }
  0xba   :  { %2370 = vmatprep.subr.bf16.mxu1 %v2369_v50  ;;  %v2393_v58 = vpack.c.bf16 %v635_v51, %v631_v49  ;;  %v650_v20 = vld [vmem:[#allocation8 + $0x2b0] sm:$0xff]  ;;  %v684_v49 = vld [vmem:[#allocation8 + $0x3c0] sm:$0xff]  ;;  %v693_v51 = vld [vmem:[#allocation8 + $0x408] sm:$0xff] }
  0xbb   :  { %2116 = vmatpush1.bf16.msra.mxu0 %v2115_v31  ;;  %v632_v31 = vld [vmem:[#allocation8 + $0x220] sm:$0xff]  ;;  %v695_v7 = vld [vmem:[#allocation8 + $0x418] sm:$0xff] }
  0xbc   :  { %2118 = vmatprep.subr.bf16.mxu0 %v2117_v32  ;;  %v641_v32 = vld [vmem:[#allocation8 + $0x268] sm:$0xff]  ;;  %v2139_v38 = vpack.c.bf16 %v632_v31, %v628_v29  ;;  %v2403_v29 = vpack.c.bf16 %v650_v20, %v646_v19  ;;  %v699_v8 = vld [vmem:[#allocation8 + $0x438] sm:$0xff]  ;;  %v692_v19 = vld [vmem:[#allocation8 + $0x400] sm:$0xff] }
  0xbd   :  { %2372 = vmatpush1.bf16.msra.mxu1 %v2371_v30  ;;  %v2141_v40 = vpack.c.bf16 %v641_v32, %v637_v0  ;;  %v639_v30 = vld [vmem:[#allocation8 + $0x258] sm:$0xff]  ;;  %v654_v0 = vld [vmem:[#allocation8 + $0x2d0] sm:$0xff]  ;;  %v696_v20 = vld [vmem:[#allocation8 + $0x420] sm:$0xff] }
  0xbe   :  { %2374 = vmatprep.subr.bf16.mxu1 %v2373_v61  ;;  %v2397_v6 = vpack.c.bf16 %v643_v62, %v639_v30  ;;  %v658_v32 = vld [vmem:[#allocation8 + $0x2f0] sm:$0xff] }
  0xbf   :  { %2120 = vmatpush1.bf16.msra.mxu0 %v2119_v42  ;;  %v640_v42 = vld [vmem:[#allocation8 + $0x260] sm:$0xff]  ;;  %v678_v62 = vld [vmem:[#allocation8 + $0x390] sm:$0xff] }
  0xc0   :  { %2122 = vmatprep.subr.bf16.mxu0 %v2121_v44  ;;  %v649_v44 = vld [vmem:[#allocation8 + $0x2a8] sm:$0xff]  ;;  %v2143_v50 = vpack.c.bf16 %v640_v42, %v636_v41  ;;  %v2407_v41 = vpack.c.bf16 %v658_v32, %v654_v0  ;;  %v2171_v0 = vpack.c.bf16 %v696_v20, %v692_v19  ;;  %v726_v20 = vld [vmem:[#allocation8 + $0x510] sm:$0xff] }
  0xc1   :  { %2376 = vmatpush1.bf16.msra.mxu1 %v2375_v9  ;;  %v2145_v52 = vpack.c.bf16 %v649_v44, %v645_v43  ;;  %v647_v9 = vld [vmem:[#allocation8 + $0x298] sm:$0xff]  ;;  %v662_v43 = vld [vmem:[#allocation8 + $0x310] sm:$0xff] }
  0xc2   :  { %2378 = vmatprep.subr.bf16.mxu1 %v2377_v10  ;;  %v2401_v18 = vpack.c.bf16 %v651_v11, %v647_v9  ;;  %v666_v44 = vld [vmem:[#allocation8 + $0x330] sm:$0xff]  ;;  %v232_v11 = vlaneseq }
  0xc3   :  { %2124 = vmatpush1.bf16.msra.mxu0 %v2123_v54  ;;  %v648_v54 = vld [vmem:[#allocation8 + $0x2a0] sm:$0xff] }
  0xc4   :  { %2126 = vmatprep.subr.bf16.mxu0 %v2125_v56  ;;  %v657_v56 = vld [vmem:[#allocation8 + $0x2e8] sm:$0xff]  ;;  %v2147_v61 = vpack.c.bf16 %v648_v54, %v644_v53  ;;  %v2411_v53 = vpack.c.bf16 %v666_v44, %v662_v43  ;;  %v711_v43 = vld [vmem:[#allocation8 + $0x498] sm:$0xff] }
  0xc5   :  { %2380 = vmatpush1.bf16.msra.mxu1 %v2379_v21  ;;  %v2149_v63 = vpack.c.bf16 %v657_v56, %v653_v55  ;;  %v655_v21 = vld [vmem:[#allocation8 + $0x2d8] sm:$0xff]  ;;  %v670_v55 = vld [vmem:[#allocation8 + $0x350] sm:$0xff] }
  0xc6   :  { %2382 = vmatprep.subr.bf16.mxu1 %v2381_v22  ;;  %v2405_v31 = vpack.c.bf16 %v659_v23, %v655_v21  ;;  %v674_v56 = vld [vmem:[#allocation8 + $0x370] sm:$0xff]  ;;  %v715_v44 = vld [vmem:[#allocation8 + $0x4b8] sm:$0xff] }
  0xc7   :  { %2128 = vmatpush1.bf16.msra.mxu0 %v2127_v2  ;;  %v656_v2 = vld [vmem:[#allocation8 + $0x2e0] sm:$0xff]  ;;  %v2415_v30 = vpack.c.bf16 %v674_v56, %v670_v55  ;;  %v694_v23 = vld [vmem:[#allocation8 + $0x410] sm:$0xff]  ;;  %v721_v55 = vld [vmem:[#allocation8 + $0x4e8] sm:$0xff] }
  0xc8   :  { %2130 = vmatprep.subr.bf16.mxu0 %v2129_v4  ;;  %v665_v4 = vld [vmem:[#allocation8 + $0x328] sm:$0xff]  ;;  %v2151_v10 = vpack.c.bf16 %v656_v2, %v652_v1  ;;  %v687_v1 = vld [vmem:[#allocation8 + $0x3d8] sm:$0xff] }
  0xc9   :  { %2384 = vmatpush1.bf16.msra.mxu1 %v2383_v33  ;;  %v2153_v12 = vpack.c.bf16 %v665_v4, %v661_v3  ;;  %v663_v33 = vld [vmem:[#allocation8 + $0x318] sm:$0xff] }
  0xca   :  { %2386 = vmatprep.subr.bf16.mxu1 %v2385_v34  ;;  %v2409_v42 = vpack.c.bf16 %v667_v35, %v663_v33  ;;  %v691_v2 = vld [vmem:[#allocation8 + $0x3f8] sm:$0xff]  ;;  %v700_v33 = vld [vmem:[#allocation8 + $0x440] sm:$0xff] }
  0xcb   :  { %2132 = vmatpush1.bf16.msra.mxu0 %v2131_v14  ;;  %v664_v14 = vld [vmem:[#allocation8 + $0x320] sm:$0xff]  ;;  %v2421_v4 = vpack.c.bf16 %v691_v2, %v687_v1  ;;  %v719_v56 = vld [vmem:[#allocation8 + $0x4d8] sm:$0xff]  ;;  %v718_v2 = vld [vmem:[#allocation8 + $0x4d0] sm:$0xff] }
  0xcc   :  { %2134 = vmatprep.subr.bf16.mxu0 %v2133_v16  ;;  %v673_v16 = vld [vmem:[#allocation8 + $0x368] sm:$0xff]  ;;  %v2155_v22 = vpack.c.bf16 %v664_v14, %v660_v13  ;;  %v3015_v14 = vld [vmem:[#allocation7] sm:$0xff] }
  0xcd   :  { %2388 = vmatpush1.bf16.msra.mxu1 %v2387_v45  ;;  %v2157_v24 = vpack.c.bf16 %v673_v16, %v669_v15  ;;  %v671_v45 = vld [vmem:[#allocation8 + $0x358] sm:$0xff] }
  0xce   :  { %2390 = vmatprep.subr.bf16.mxu1 %v2389_v46  ;;  %v2413_v54 = vpack.c.bf16 %v675_v47, %v671_v45  ;;  %v708_v47 = vld [vmem:[#allocation8 + $0x480] sm:$0xff] }
  0xcf   :  { %2136 = vmatpush1.bf16.msra.mxu0 %v2135_v26  ;;  %v672_v26 = vld [vmem:[#allocation8 + $0x360] sm:$0xff] }
  0xd0   :  { %2138 = vmatprep.subr.bf16.mxu0 %v2137_v28  ;;  %v681_v28 = vld [vmem:[#allocation8 + $0x3a8] sm:$0xff]  ;;  %v2159_v34 = vpack.c.bf16 %v672_v26, %v668_v25 }
  0xd1   :  { %2392 = vmatpush1.bf16.msra.mxu1 %v2391_v57  ;;  %v2161_v36 = vpack.c.bf16 %v681_v28, %v677_v27  ;;  %v701_v25 = vld [vmem:[#allocation8 + $0x448] sm:$0xff]  ;;  %v703_v28 = vld [vmem:[#allocation8 + $0x458] sm:$0xff] }
  0xd2   :  { %2394 = vmatprep.subr.bf16.mxu1 %v2393_v58  ;;  %v679_v58 = vld [vmem:[#allocation8 + $0x398] sm:$0xff]  ;;  %v705_v27 = vld [vmem:[#allocation8 + $0x468] sm:$0xff] }
  0xd3   :  { %2140 = vmatpush1.bf16.msra.mxu0 %v2139_v38  ;;  %v680_v38 = vld [vmem:[#allocation8 + $0x3a0] sm:$0xff] }
  0xd4   :  { %2142 = vmatprep.subr.bf16.mxu0 %v2141_v40  ;;  %v689_v40 = vld [vmem:[#allocation8 + $0x3e8] sm:$0xff]  ;;  %v2163_v46 = vpack.c.bf16 %v680_v38, %v676_v37  ;;  %v702_v38 = vld [vmem:[#allocation8 + $0x450] sm:$0xff] }
  0xd5   :  { %2396 = vmatpush1.bf16.msra.mxu1 %v2395_v5  ;;  %v2165_v48 = vpack.c.bf16 %v689_v40, %v685_v39  ;;  %v686_v5 = vld [vmem:[#allocation8 + $0x3d0] sm:$0xff]  ;;  %v709_v40 = vld [vmem:[#allocation8 + $0x488] sm:$0xff] }
  0xd6   :  { %2398 = vmatprep.subr.bf16.mxu1 %v2397_v6  ;;  %v690_v6 = vld [vmem:[#allocation8 + $0x3f0] sm:$0xff] }
  0xd7   :  { %2144 = vmatpush1.bf16.msra.mxu0 %v2143_v50  ;;  %v688_v50 = vld [vmem:[#allocation8 + $0x3e0] sm:$0xff]  ;;  %v2423_v9 = vpack.c.bf16 %v690_v6, %v686_v5  ;;  %v706_v39 = vld [vmem:[#allocation8 + $0x470] sm:$0xff]  ;;  %v729_v6 = vld [vmem:[#allocation8 + $0x528] sm:$0xff] }
  0xd8   :  { %2146 = vmatprep.subr.bf16.mxu0 %v2145_v52  ;;  %v697_v52 = vld [vmem:[#allocation8 + $0x428] sm:$0xff]  ;;  %v2167_v57 = vpack.c.bf16 %v688_v50, %v684_v49  ;;  %v2433_v50 = vpack.c.bf16 %v715_v44, %v711_v43 }
  0xd9   :  { %2400 = vmatpush1.bf16.msra.mxu1 %v2399_v17  ;;  %v2169_v60 = vpack.c.bf16 %v697_v52, %v693_v51  ;;  %v710_v51 = vld [vmem:[#allocation8 + $0x490] sm:$0xff] }
  0xda   :  { %2402 = vmatprep.subr.bf16.mxu1 %v2401_v18  ;;  %v714_v52 = vld [vmem:[#allocation8 + $0x4b0] sm:$0xff] }
  0xdb   :  { %2148 = vmatpush1.bf16.msra.mxu0 %v2147_v61  ;;  %v2417_v61 = vpack.c.bf16 %v683_v59, %v679_v58 }
  0xdc   :  { %2150 = vmatprep.subr.bf16.mxu0 %v2149_v63  ;;  %v682_v63 = vld [vmem:[#allocation8 + $0x3b0] sm:$0xff] }
  0xdd   :  { %2404 = vmatpush1.bf16.msra.mxu1 %v2403_v29  ;;  %v2419_v3 = vpack.c.bf16 %v682_v63, %v678_v62  ;;  %v707_v29 = vld [vmem:[#allocation8 + $0x478] sm:$0xff] }
  0xde   :  { %2406 = vmatprep.subr.bf16.mxu1 %v2405_v31  ;;  %v2429_v37 = vpack.c.bf16 %v707_v29, %v703_v28  ;;  %v732_v28 = vld [vmem:[#allocation8 + $0x540] sm:$0xff] }
  0xdf   :  { %2152 = vmatpush1.bf16.msra.mxu0 %v2151_v10  ;;  %v2425_v10 = vpack.c.bf16 %v699_v8, %v695_v7  ;;  %v727_v7 = vld [vmem:[#allocation8 + $0x518] sm:$0xff]  ;;  %v736_v29 = vld [vmem:[#allocation8 + $0x560] sm:$0xff] }
  0xe0   :  { %2154 = vmatprep.subr.bf16.mxu0 %v2153_v12  ;;  %v3012_v12 = vshrl.u32 %v232_v11, 7  ;;  %v731_v8 = vld [vmem:[#allocation8 + $0x538] sm:$0xff] }
  0xe1   :  { %2408 = vmatpush1.bf16.msra.mxu1 %v2407_v41  ;;  %v2441_v19 = vpack.c.bf16 %v731_v8, %v727_v7  ;;  %v758_v7 = vld [vmem:[#allocation8 + $0x610] sm:$0xff] }
  0xe2   :  { %2410 = vmatprep.subr.bf16.mxu1 %v2409_v42  ;;  %v234_v13 = vsub.s32 0, %v3012_v12  ;;  %v238_v15 = vsub.s32 1, %v3012_v12  ;;  %v246_v41 = vsub.s32 3, %v3012_v12  ;;  %v713_v42 = vld [vmem:[#allocation8 + $0x4a8] sm:$0xff]  ;;  %v762_v8 = vld [vmem:[#allocation8 + $0x630] sm:$0xff] }
  0xe3   :  { %2156 = vmatpush1.bf16.msra.mxu0 %v2155_v22  ;;  %v2177_v49 = vpack.c.bf16 %v713_v42, %v709_v40  ;;  %v740_v40 = vld [vmem:[#allocation8 + $0x580] sm:$0xff] }
  0xe4   :  { %2158 = vmatprep.subr.bf16.mxu0 %v2157_v24  ;;  %v235_v16 = vrot.slane %v3015_v14, %v234_v13  ;;  %v239_v17 = vrot.slane %v3015_v14, %v238_v15  ;;  %v698_v24 = vld [vmem:[#allocation8 + $0x430] sm:$0xff]  ;;  %v744_v42 = vld [vmem:[#allocation8 + $0x5a0] sm:$0xff] }
  0xe5   :  { %2412 = vmatpush1.bf16.msra.mxu1 %v2411_v53  ;;  %v2427_v32 = vpack.c.bf16 %v698_v24, %v694_v23  ;;  %v717_v53 = vld [vmem:[#allocation8 + $0x4c8] sm:$0xff]  ;;  %v735_v24 = vld [vmem:[#allocation8 + $0x558] sm:$0xff] }
  0xe6   :  { %2414 = vmatprep.subr.bf16.mxu1 %v2413_v54  ;;  %v247_v54 = vrot.slane %v3015_v14, %v246_v41  ;;  %v2181_v63 = vpack.c.bf16 %v721_v55, %v717_v53  ;;  %v737_v23 = vld [vmem:[#allocation8 + $0x568] sm:$0xff]  ;;  %v748_v53 = vld [vmem:[#allocation8 + $0x5c0] sm:$0xff] }
  0xe7   :  { %2160 = vmatpush1.bf16.msra.mxu0 %v2159_v34  ;;  %v704_v34 = vld [vmem:[#allocation8 + $0x460] sm:$0xff] }
  0xe8   :  { %2162 = vmatprep.subr.bf16.mxu0 %v2161_v36  ;;  %v2173_v36 = vpack.c.bf16 %v705_v27, %v701_v25  ;;  %v2175_v45 = vpack.c.bf16 %v704_v34, %v700_v33  ;;  %v739_v25 = vld [vmem:[#allocation8 + $0x578] sm:$0xff]  ;;  %v738_v33 = vld [vmem:[#allocation8 + $0x570] sm:$0xff]  ;;  %v741_v34 = vld [vmem:[#allocation8 + $0x588] sm:$0xff] }
  0xe9   :  { %2416 = vmatpush1.bf16.msra.mxu1 %v2415_v30  ;;  %v716_v30 = vld [vmem:[#allocation8 + $0x4c0] sm:$0xff] }
  0xea   :  { %2418 = vmatprep.subr.bf16.mxu1 %v2417_v61  ;;  %v720_v61 = vld [vmem:[#allocation8 + $0x4e0] sm:$0xff] }
  0xeb   :  { %2164 = vmatpush1.bf16.msra.mxu0 %v2163_v46  ;;  %v2431_v46 = vpack.c.bf16 %v706_v39, %v702_v38  ;;  %v2191_v38 = vpack.c.bf16 %v736_v29, %v732_v28  ;;  %v775_v28 = vld [vmem:[#allocation8 + $0x698] sm:$0xff] }
  0xec   :  { %2166 = vmatprep.subr.bf16.mxu0 %v2165_v48  ;;  %v712_v48 = vld [vmem:[#allocation8 + $0x4a0] sm:$0xff]  ;;  %v779_v29 = vld [vmem:[#allocation8 + $0x6b8] sm:$0xff] }
  0xed   :  { %2420 = vmatpush1.bf16.msra.mxu1 %v2419_v3  ;;  %v2179_v59 = vpack.c.bf16 %v712_v48, %v708_v47  ;;  %v722_v3 = vld [vmem:[#allocation8 + $0x4f0] sm:$0xff]  ;;  %v749_v47 = vld [vmem:[#allocation8 + $0x5c8] sm:$0xff] }
  0xee   :  { %2422 = vmatprep.subr.bf16.mxu1 %v2421_v4  ;;  %v725_v4 = vld [vmem:[#allocation8 + $0x508] sm:$0xff]  ;;  %v2439_v11 = vpack.c.bf16 %v722_v3, %v718_v2  ;;  %v756_v2 = vld [vmem:[#allocation8 + $0x600] sm:$0xff] }
  0xef   :  { %2168 = vmatpush1.bf16.msra.mxu0 %v2167_v57  ;;  %v723_v57 = vld [vmem:[#allocation8 + $0x4f8] sm:$0xff]  ;;  %v753_v48 = vld [vmem:[#allocation8 + $0x5e8] sm:$0xff]  ;;  %v760_v3 = vld [vmem:[#allocation8 + $0x620] sm:$0xff] }
  0xf0   :  { %2170 = vmatprep.subr.bf16.mxu0 %v2169_v60  ;;  %v2435_v60 = vpack.c.bf16 %v714_v52, %v710_v51  ;;  %v2437_v1 = vpack.c.bf16 %v723_v57, %v719_v56  ;;  %v2195_v51 = vpack.c.bf16 %v744_v42, %v740_v40  ;;  %v2197_v55 = vpack.c.bf16 %v753_v48, %v749_v47  ;;  %v750_v57 = vld [vmem:[#allocation8 + $0x5d0] sm:$0xff]  ;;  %v783_v40 = vld [vmem:[#allocation8 + $0x6d8] sm:$0xff]  ;;  %v784_v47 = vld [vmem:[#allocation8 + $0x6e0] sm:$0xff] }
  0xf1   :  { %2424 = vmatpush1.bf16.msra.mxu1 %v2423_v9  ;;  %v787_v42 = vld [vmem:[#allocation8 + $0x6f8] sm:$0xff] }
  0xf2   :  { %2426 = vmatprep.subr.bf16.mxu1 %v2425_v10  ;;  %v2183_v10 = vpack.c.bf16 %v720_v61, %v716_v30  ;;  %v761_v30 = vld [vmem:[#allocation8 + $0x628] sm:$0xff]  ;;  %v759_v61 = vld [vmem:[#allocation8 + $0x618] sm:$0xff] }
 0x165   :  { %v338_v18 = vpop.f32.mrb[0].mxu0 }
 0x166   :  { %v339_v21 = vadd.f32 %v338_v18, %v235_v16  ;;  %v340_v22 = vpop.f32.mrb[1].mxu0  ;;  %v724_v16 = vld [vmem:[#allocation8 + $0x500] sm:$0xff]  ;;  %v2185_v18 = vpack.c.bf16 %v729_v6, %v725_v4 }
 0x167   :  { %v341_v26 = vadd.f32 %v340_v22, %v239_v17  ;;  %v3028_v58 = vpop.f32.mrb[0].mxu1  ;;  %v728_v17 = vld [vmem:[#allocation8 + $0x520] sm:$0xff]  ;;  %v733_v22 = vld [vmem:[#allocation8 + $0x548] sm:$0xff] }
 0x168   :  { %v556_v35 = vmax.f32 %v339_v21, 0.0  ;;  %v411_v62 = vpop.f32.mrb[1].mxu1  ;;  %v730_v21 = vld [vmem:[#allocation8 + $0x530] sm:$0xff] }
 0x169   :  { %v557_v31 = vmax.f32 %v341_v26, 0.0  ;;  %v412_v5 = vadd.f32 %v411_v62, %v247_v54  ;;  %v2187_v26 = vpack.c.bf16 %v728_v17, %v724_v16  ;;  %v2443_v27 = vpack.c.bf16 %v730_v21, %v726_v20  ;;  %v752_v54 = vld [vmem:[#allocation8 + $0x5e0] sm:$0xff]  ;;  %v763_v62 = vld [vmem:[#allocation8 + $0x638] sm:$0xff] }
 0x16a   :  { %v2457_v6 = vpack.c.bf16 %v763_v62, %v759_v61  ;;  %v767_v16 = vld [vmem:[#allocation8 + $0x658] sm:$0xff]  ;;  %v764_v20 = vld [vmem:[#allocation8 + $0x640] sm:$0xff] }
 0x16b   :  { %1162 = vmatprep.mubr.f32.mxu0 %v557_v31  ;;  %1446 = vmatprep.mubr.f32.mxu1 %v557_v31  ;;  %v559_v9 = vmax.f32 %v412_v5, 0.0  ;;  %v2189_v31 = vpack.c.bf16 %v737_v23, %v733_v22  ;;  %v771_v17 = vld [vmem:[#allocation8 + $0x678] sm:$0xff]  ;;  %v768_v21 = vld [vmem:[#allocation8 + $0x660] sm:$0xff] }
 0x16c   :  { %1163 = vmatmul.mubr.f32.vlgmr.msra.gmra.mrb[4].mxu0 %v556_v35  ;;  %1447 = vmatmul.mubr.f32.vlgmr.msra.gmra.mrb[4].mxu1 %v556_v35  ;;  %v745_v35 = vld [vmem:[#allocation8 + $0x5a8] sm:$0xff]  ;;  %v2461_v23 = vpack.c.bf16 %v771_v17, %v767_v16 }
 0x16d   :  { %2172 = vmatpush1.bf16.msra.mxu0 %v2171_v0  ;;  %2428 = vmatpush1.bf16.msra.mxu1 %v2427_v32  ;;  %v2445_v0 = vpack.c.bf16 %v739_v25, %v735_v24  ;;  %v734_v32 = vld [vmem:[#allocation8 + $0x550] sm:$0xff]  ;;  %v2193_v43 = vpack.c.bf16 %v745_v35, %v741_v34  ;;  %v2465_v35 = vpack.c.bf16 %v779_v29, %v775_v28  ;;  %v808_v28 = vld [vmem:[#allocation8 + $0x7a0] sm:$0xff] }
 0x16e   :  { %2174 = vmatprep.subr.bf16.mxu0 %v2173_v36  ;;  %2430 = vmatprep.subr.bf16.mxu1 %v2429_v37  ;;  %v743_v36 = vld [vmem:[#allocation8 + $0x598] sm:$0xff]  ;;  %v2447_v39 = vpack.c.bf16 %v738_v33, %v734_v32  ;;  %v766_v24 = vld [vmem:[#allocation8 + $0x650] sm:$0xff]  ;;  %v772_v32 = vld [vmem:[#allocation8 + $0x680] sm:$0xff] }
 0x16f   :  { %1233 = vmatprep.mubr.f32.mxu0 %v559_v9  ;;  %1517 = vmatprep.mubr.f32.mxu1 %v559_v9  ;;  %v747_v37 = vld [vmem:[#allocation8 + $0x5b8] sm:$0xff]  ;;  %v765_v9 = vld [vmem:[#allocation8 + $0x648] sm:$0xff]  ;;  %v770_v25 = vld [vmem:[#allocation8 + $0x670] sm:$0xff] }
 0x170   :  { %v2449_v44 = vpack.c.bf16 %v747_v37, %v743_v36  ;;  %v776_v33 = vld [vmem:[#allocation8 + $0x6a0] sm:$0xff]  ;;  %v774_v36 = vld [vmem:[#allocation8 + $0x690] sm:$0xff] }
 0x171   :  { %2176 = vmatpush1.bf16.msra.mxu0 %v2175_v45  ;;  %2432 = vmatpush1.bf16.msra.mxu1 %v2431_v46  ;;  %v742_v45 = vld [vmem:[#allocation8 + $0x590] sm:$0xff] }
 0x172   :  { %2178 = vmatprep.subr.bf16.mxu0 %v2177_v49  ;;  %2434 = vmatprep.subr.bf16.mxu1 %v2433_v50  ;;  %v746_v46 = vld [vmem:[#allocation8 + $0x5b0] sm:$0xff]  ;;  %v751_v49 = vld [vmem:[#allocation8 + $0x5d8] sm:$0xff] }
 0x173   :  { %v755_v50 = vld [vmem:[#allocation8 + $0x5f8] sm:$0xff]  ;;  %v2451_v52 = vpack.c.bf16 %v746_v46, %v742_v45  ;;  %v778_v37 = vld [vmem:[#allocation8 + $0x6b0] sm:$0xff]  ;;  %v780_v46 = vld [vmem:[#allocation8 + $0x6c0] sm:$0xff] }
 0x174   :  { %v2453_v56 = vpack.c.bf16 %v755_v50, %v751_v49  ;;  %v2467_v45 = vpack.c.bf16 %v778_v37, %v774_v36  ;;  %v2469_v50 = vpack.c.bf16 %v787_v42, %v783_v40  ;;  %v819_v36 = vld [vmem:[#allocation8 + $0x7f8] sm:$0xff]  ;;  %v254_v37 = vsub.s32 5, %v3012_v12  ;;  %v812_v42 = vld [vmem:[#allocation8 + $0x7c0] sm:$0xff] }
 0x175   :  { %2180 = vmatpush1.bf16.msra.mxu0 %v2179_v59  ;;  %2436 = vmatpush1.bf16.msra.mxu1 %v2435_v60  ;;  %v754_v59 = vld [vmem:[#allocation8 + $0x5f0] sm:$0xff]  ;;  %v757_v60 = vld [vmem:[#allocation8 + $0x608] sm:$0xff] }
 0x176   :  { %2182 = vmatprep.subr.bf16.mxu0 %v2181_v63  ;;  %2438 = vmatprep.subr.bf16.mxu1 %v2437_v1  ;;  %v2199_v63 = vpack.c.bf16 %v752_v54, %v748_v53  ;;  %v2455_v1 = vpack.c.bf16 %v754_v59, %v750_v57  ;;  %v2201_v5 = vpack.c.bf16 %v761_v30, %v757_v60  ;;  %v789_v53 = vld [vmem:[#allocation8 + $0x708] sm:$0xff]  ;;  %v788_v60 = vld [vmem:[#allocation8 + $0x700] sm:$0xff] }
 0x177   :  { %v793_v54 = vld [vmem:[#allocation8 + $0x728] sm:$0xff]  ;;  %v2215_v57 = vpack.c.bf16 %v784_v47, %v780_v46  ;;  %v792_v30 = vld [vmem:[#allocation8 + $0x720] sm:$0xff]  ;;  %v814_v47 = vld [vmem:[#allocation8 + $0x7d0] sm:$0xff] }
 0x178   :  { %v2217_v61 = vpack.c.bf16 %v793_v54, %v789_v53  ;;  %v827_v53 = vld [vmem:[#allocation8 + $0x838] sm:$0xff]  ;;  %v255_v54 = vrot.slane %v3015_v14, %v254_v37 }
 0x179   :  { %2184 = vmatpush1.bf16.msra.mxu0 %v2183_v10  ;;  %2440 = vmatpush1.bf16.msra.mxu1 %v2439_v11  ;;  %v769_v11 = vld [vmem:[#allocation8 + $0x668] sm:$0xff] }
 0x17a   :  { %2186 = vmatprep.subr.bf16.mxu0 %v2185_v18  ;;  %2442 = vmatprep.subr.bf16.mxu1 %v2441_v19  ;;  %v2203_v18 = vpack.c.bf16 %v760_v3, %v756_v2  ;;  %v2459_v19 = vpack.c.bf16 %v762_v8, %v758_v7  ;;  %v2205_v22 = vpack.c.bf16 %v769_v11, %v765_v9  ;;  %v797_v2 = vld [vmem:[#allocation8 + $0x748] sm:$0xff]  ;;  %v796_v9 = vld [vmem:[#allocation8 + $0x740] sm:$0xff] }
 0x17b   :  { %v801_v3 = vld [vmem:[#allocation8 + $0x768] sm:$0xff]  ;;  %v2219_v7 = vpack.c.bf16 %v792_v30, %v788_v60  ;;  %v800_v11 = vld [vmem:[#allocation8 + $0x760] sm:$0xff] }
 0x17c   :  { %v2221_v16 = vpack.c.bf16 %v801_v3, %v797_v2  ;;  %v824_v60 = vld [vmem:[#allocation8 + $0x820] sm:$0xff]  ;;  %v833_v2 = vld [vmem:[#allocation8 + $0x868] sm:$0xff]  ;;  %v831_v3 = vld [vmem:[#allocation8 + $0x858] sm:$0xff] }
 0x17d   :  { %2188 = vmatpush1.bf16.msra.mxu0 %v2187_v26  ;;  %2444 = vmatpush1.bf16.msra.mxu1 %v2443_v27  ;;  %v773_v26 = vld [vmem:[#allocation8 + $0x688] sm:$0xff] }
 0x17e   :  { %2190 = vmatprep.subr.bf16.mxu0 %v2189_v31  ;;  %2446 = vmatprep.subr.bf16.mxu1 %v2445_v0  ;;  %v777_v27 = vld [vmem:[#allocation8 + $0x6a8] sm:$0xff]  ;;  %v2207_v31 = vpack.c.bf16 %v768_v21, %v764_v20  ;;  %v2463_v0 = vpack.c.bf16 %v770_v25, %v766_v24  ;;  %v242_v24 = vsub.s32 2, %v3012_v12  ;;  %v2223_v25 = vpack.c.bf16 %v800_v11, %v796_v9  ;;  %v832_v9 = vld [vmem:[#allocation8 + $0x860] sm:$0xff] }
 0x17f   :  { %v2209_v34 = vpack.c.bf16 %v777_v27, %v773_v26  ;;  %v805_v20 = vld [vmem:[#allocation8 + $0x788] sm:$0xff]  ;;  %v804_v27 = vld [vmem:[#allocation8 + $0x780] sm:$0xff] }
 0x180   :  { %v809_v21 = vld [vmem:[#allocation8 + $0x7a8] sm:$0xff] }
 0x181   :  { %2192 = vmatpush1.bf16.msra.mxu0 %v2191_v38  ;;  %2448 = vmatpush1.bf16.msra.mxu1 %v2447_v39  ;;  %v781_v38 = vld [vmem:[#allocation8 + $0x6c8] sm:$0xff]  ;;  %v2225_v29 = vpack.c.bf16 %v809_v21, %v805_v20  ;;  %v839_v21 = vld [vmem:[#allocation8 + $0x898] sm:$0xff] }
 0x182   :  { %2194 = vmatprep.subr.bf16.mxu0 %v2193_v43  ;;  %2450 = vmatprep.subr.bf16.mxu1 %v2449_v44  ;;  %v785_v39 = vld [vmem:[#allocation8 + $0x6e8] sm:$0xff]  ;;  %v2211_v44 = vpack.c.bf16 %v776_v33, %v772_v32  ;;  %v810_v32 = vld [vmem:[#allocation8 + $0x7b0] sm:$0xff] }
 0x183   :  { %v2213_v49 = vpack.c.bf16 %v785_v39, %v781_v38  ;;  %v813_v33 = vld [vmem:[#allocation8 + $0x7c8] sm:$0xff]  ;;  %v243_v38 = vrot.slane %v3015_v14, %v242_v24  ;;  %v2227_v39 = vpack.c.bf16 %v808_v28, %v804_v27  ;;  %v840_v27 = vld [vmem:[#allocation8 + $0x8a0] sm:$0xff] }
 0x184   :  { %v841_v20 = vld [vmem:[#allocation8 + $0x8a8] sm:$0xff] }
 0x185   :  { %2196 = vmatpush1.bf16.msra.mxu0 %v2195_v51  ;;  %2452 = vmatpush1.bf16.msra.mxu1 %v2451_v52  ;;  %v3030_v4 = vpop.f32.mrb[2].mxu0  ;;  %v782_v51 = vld [vmem:[#allocation8 + $0x6d0] sm:$0xff] }
 0x186   :  { %2198 = vmatprep.subr.bf16.mxu0 %v2197_v55  ;;  %2454 = vmatprep.subr.bf16.mxu1 %v2453_v56  ;;  %v3032_v10 = vpop.f32.mrb[3].mxu0  ;;  %v786_v52 = vld [vmem:[#allocation8 + $0x6f0] sm:$0xff]  ;;  %v791_v55 = vld [vmem:[#allocation8 + $0x718] sm:$0xff] }
 0x187   :  { %v3034_v43 = vpop.f32.mrb[2].mxu1  ;;  %v795_v56 = vld [vmem:[#allocation8 + $0x738] sm:$0xff]  ;;  %v2471_v59 = vpack.c.bf16 %v786_v52, %v782_v51  ;;  %v825_v51 = vld [vmem:[#allocation8 + $0x828] sm:$0xff]  ;;  %v483_v14 = vadd.f32 %v3032_v10, %v255_v54  ;;  %v856_v54 = vld [vmem:[#allocation8 + $0x920] sm:$0xff] }
 0x188   :  { %v3036_v48 = vpop.f32.mrb[3].mxu1  ;;  %v2473_v62 = vpack.c.bf16 %v795_v56, %v791_v55  ;;  %v823_v52 = vld [vmem:[#allocation8 + $0x818] sm:$0xff]  ;;  %v410_v55 = vadd.f32 %v3028_v58, %v243_v38  ;;  %v844_v38 = vld [vmem:[#allocation8 + $0x8c0] sm:$0xff] }
 0x189   :  { %2200 = vmatpush1.bf16.msra.mxu0 %v2199_v63  ;;  %2456 = vmatpush1.bf16.msra.mxu1 %v2455_v1  ;;  %v790_v63 = vld [vmem:[#allocation8 + $0x710] sm:$0xff] }
 0x18a   :  { %2202 = vmatprep.subr.bf16.mxu0 %v2201_v5  ;;  %2458 = vmatprep.subr.bf16.mxu1 %v2457_v6  ;;  %v794_v1 = vld [vmem:[#allocation8 + $0x730] sm:$0xff]  ;;  %v799_v5 = vld [vmem:[#allocation8 + $0x758] sm:$0xff] }
 0x18b   :  { %v803_v6 = vld [vmem:[#allocation8 + $0x778] sm:$0xff]  ;;  %v2475_v8 = vpack.c.bf16 %v794_v1, %v790_v63  ;;  %v826_v63 = vld [vmem:[#allocation8 + $0x830] sm:$0xff]  ;;  %v829_v1 = vld [vmem:[#allocation8 + $0x848] sm:$0xff] }
 0x18c   :  { %v2477_v17 = vpack.c.bf16 %v803_v6, %v799_v5  ;;  %v835_v5 = vld [vmem:[#allocation8 + $0x878] sm:$0xff]  ;;  %v558_v6 = vmax.f32 %v410_v55, 0.0  ;;  %v2237_v11 = vpack.c.bf16 %v833_v2, %v829_v1  ;;  %v860_v2 = vld [vmem:[#allocation8 + $0x940] sm:$0xff] }
 0x18d   :  { %2204 = vmatpush1.bf16.msra.mxu0 %v2203_v18  ;;  %2460 = vmatpush1.bf16.msra.mxu1 %v2459_v19  ;;  %v798_v18 = vld [vmem:[#allocation8 + $0x750] sm:$0xff] }
 0x18e   :  { %2206 = vmatprep.subr.bf16.mxu0 %v2205_v22  ;;  %2462 = vmatprep.subr.bf16.mxu1 %v2461_v23  ;;  %v802_v19 = vld [vmem:[#allocation8 + $0x770] sm:$0xff]  ;;  %v807_v22 = vld [vmem:[#allocation8 + $0x798] sm:$0xff] }
 0x18f   :  { %v811_v23 = vld [vmem:[#allocation8 + $0x7b8] sm:$0xff]  ;;  %v2479_v26 = vpack.c.bf16 %v802_v19, %v798_v18  ;;  %v834_v18 = vld [vmem:[#allocation8 + $0x870] sm:$0xff]  ;;  %v837_v19 = vld [vmem:[#allocation8 + $0x888] sm:$0xff] }
 0x190   :  { %v2241_v28 = vpack.c.bf16 %v841_v20, %v837_v19  ;;  %v872_v19 = vld [vmem:[#allocation8 + $0x9a0] sm:$0xff] }
 0x191   :  { %2208 = vmatpush1.bf16.msra.mxu0 %v2207_v31  ;;  %2464 = vmatpush1.bf16.msra.mxu1 %v2463_v0  ;;  %v2481_v31 = vpack.c.bf16 %v811_v23, %v807_v22  ;;  %v806_v0 = vld [vmem:[#allocation8 + $0x790] sm:$0xff]  ;;  %v843_v22 = vld [vmem:[#allocation8 + $0x8b8] sm:$0xff]  ;;  %v561_v23 = vmax.f32 %v483_v14, 0.0 }
 0x192   :  { %2210 = vmatprep.subr.bf16.mxu0 %v2209_v34  ;;  %2466 = vmatprep.subr.bf16.mxu1 %v2465_v35  ;;  %v817_v34 = vld [vmem:[#allocation8 + $0x7e8] sm:$0xff]  ;;  %v815_v35 = vld [vmem:[#allocation8 + $0x7d8] sm:$0xff]  ;;  %v2483_v40 = vpack.c.bf16 %v810_v32, %v806_v0  ;;  %v842_v0 = vld [vmem:[#allocation8 + $0x8b0] sm:$0xff] }
 0x193   :  { %v2485_v46 = vpack.c.bf16 %v819_v36, %v815_v35  ;;  %v845_v32 = vld [vmem:[#allocation8 + $0x8c8] sm:$0xff]  ;;  %v851_v35 = vld [vmem:[#allocation8 + $0x8f8] sm:$0xff] }
 0x195   :  { %2212 = vmatpush1.bf16.msra.mxu0 %v2211_v44  ;;  %2468 = vmatpush1.bf16.msra.mxu1 %v2467_v45  ;;  %v816_v44 = vld [vmem:[#allocation8 + $0x7e0] sm:$0xff]  ;;  %v2229_v45 = vpack.c.bf16 %v817_v34, %v813_v33  ;;  %v849_v33 = vld [vmem:[#allocation8 + $0x8e8] sm:$0xff]  ;;  %v847_v34 = vld [vmem:[#allocation8 + $0x8d8] sm:$0xff] }
 0x196   :  { %2214 = vmatprep.subr.bf16.mxu0 %v2213_v49  ;;  %2470 = vmatprep.subr.bf16.mxu1 %v2469_v50  ;;  %v818_v49 = vld [vmem:[#allocation8 + $0x7f0] sm:$0xff]  ;;  %v821_v50 = vld [vmem:[#allocation8 + $0x808] sm:$0xff]  ;;  %v2231_v56 = vpack.c.bf16 %v816_v44, %v812_v42  ;;  %v2501_v42 = vpack.c.bf16 %v851_v35, %v847_v34 }
 0x197   :  { %v2233_v30 = vpack.c.bf16 %v825_v51, %v821_v50  ;;  %v846_v44 = vld [vmem:[#allocation8 + $0x8d0] sm:$0xff]  ;;  %v859_v50 = vld [vmem:[#allocation8 + $0x938] sm:$0xff] }
 0x198   :  { %v878_v34 = vld [vmem:[#allocation8 + $0x9d0] sm:$0xff] }
 0x199   :  { %2216 = vmatpush1.bf16.msra.mxu0 %v2215_v57  ;;  %2472 = vmatpush1.bf16.msra.mxu1 %v2471_v59  ;;  %v2487_v57 = vpack.c.bf16 %v818_v49, %v814_v47  ;;  %v820_v59 = vld [vmem:[#allocation8 + $0x800] sm:$0xff]  ;;  %v857_v47 = vld [vmem:[#allocation8 + $0x928] sm:$0xff]  ;;  %v855_v49 = vld [vmem:[#allocation8 + $0x918] sm:$0xff] }
 0x19a   :  { %2218 = vmatprep.subr.bf16.mxu0 %v2217_v61  ;;  %2474 = vmatprep.subr.bf16.mxu1 %v2473_v62  ;;  %v2489_v61 = vpack.c.bf16 %v827_v53, %v823_v52  ;;  %v822_v62 = vld [vmem:[#allocation8 + $0x810] sm:$0xff]  ;;  %v2235_v58 = vpack.c.bf16 %v824_v60, %v820_v59  ;;  %v852_v53 = vld [vmem:[#allocation8 + $0x900] sm:$0xff]  ;;  %v861_v60 = vld [vmem:[#allocation8 + $0x948] sm:$0xff] }
 0x19b   :  { %v858_v59 = vld [vmem:[#allocation8 + $0x930] sm:$0xff] }
 0x19c   :  { %v882_v35 = vld [vmem:[#allocation8 + $0x9f0] sm:$0xff] }
 0x19d   :  { %2220 = vmatpush1.bf16.msra.mxu0 %v2219_v7  ;;  %2476 = vmatpush1.bf16.msra.mxu1 %v2475_v8  ;;  %v2491_v7 = vpack.c.bf16 %v826_v63, %v822_v62  ;;  %v828_v8 = vld [vmem:[#allocation8 + $0x840] sm:$0xff]  ;;  %v867_v62 = vld [vmem:[#allocation8 + $0x978] sm:$0xff]  ;;  %v2251_v63 = vpack.c.bf16 %v856_v54, %v852_v53 }
 0x19e   :  { %2222 = vmatprep.subr.bf16.mxu0 %v2221_v16  ;;  %2478 = vmatprep.subr.bf16.mxu1 %v2477_v17  ;;  %v2493_v16 = vpack.c.bf16 %v835_v5, %v831_v3  ;;  %v830_v17 = vld [vmem:[#allocation8 + $0x850] sm:$0xff]  ;;  %v2239_v10 = vpack.c.bf16 %v832_v9, %v828_v8  ;;  %v864_v3 = vld [vmem:[#allocation8 + $0x960] sm:$0xff]  ;;  %v873_v8 = vld [vmem:[#allocation8 + $0x9a8] sm:$0xff] }
 0x19f   :  { %v871_v9 = vld [vmem:[#allocation8 + $0x998] sm:$0xff] }
 0x1a0   :  { %v895_v53 = vld [vmem:[#allocation8 + $0xa58] sm:$0xff] }
 0x1a1   :  { %2224 = vmatpush1.bf16.msra.mxu0 %v2223_v25  ;;  %2480 = vmatpush1.bf16.msra.mxu1 %v2479_v26  ;;  %v2495_v25 = vpack.c.bf16 %v834_v18, %v830_v17  ;;  %v836_v26 = vld [vmem:[#allocation8 + $0x880] sm:$0xff]  ;;  %v899_v54 = vld [vmem:[#allocation8 + $0xa78] sm:$0xff] }
 0x1a2   :  { %2226 = vmatprep.subr.bf16.mxu0 %v2225_v29  ;;  %2482 = vmatprep.subr.bf16.mxu1 %v2481_v31  ;;  %v2497_v29 = vpack.c.bf16 %v843_v22, %v839_v21  ;;  %v838_v31 = vld [vmem:[#allocation8 + $0x890] sm:$0xff]  ;;  %v2243_v36 = vpack.c.bf16 %v840_v27, %v836_v26  ;;  %v868_v18 = vld [vmem:[#allocation8 + $0x980] sm:$0xff]  ;;  %v879_v26 = vld [vmem:[#allocation8 + $0x9d8] sm:$0xff] }
 0x1a3   :  { %v2499_v37 = vpack.c.bf16 %v842_v0, %v838_v31  ;;  %v870_v22 = vld [vmem:[#allocation8 + $0x990] sm:$0xff]  ;;  %v883_v27 = vld [vmem:[#allocation8 + $0x9f8] sm:$0xff]  ;;  %v876_v31 = vld [vmem:[#allocation8 + $0x9c0] sm:$0xff] }
 0x1a4   :  { %v880_v0 = vld [vmem:[#allocation8 + $0x9e0] sm:$0xff] }
 0x1a5   :  { %2228 = vmatpush1.bf16.msra.mxu0 %v2227_v39  ;;  %2484 = vmatpush1.bf16.msra.mxu1 %v2483_v40  ;;  %v848_v39 = vld [vmem:[#allocation8 + $0x8e0] sm:$0xff]  ;;  %v2245_v40 = vpack.c.bf16 %v849_v33, %v845_v32  ;;  %v2517_v33 = vpack.c.bf16 %v883_v27, %v879_v26  ;;  %v910_v26 = vld [vmem:[#allocation8 + $0xad0] sm:$0xff] }
 0x1a6   :  { %2230 = vmatprep.subr.bf16.mxu0 %v2229_v45  ;;  %2486 = vmatprep.subr.bf16.mxu1 %v2485_v46  ;;  %v850_v45 = vld [vmem:[#allocation8 + $0x8f0] sm:$0xff]  ;;  %v853_v46 = vld [vmem:[#allocation8 + $0x908] sm:$0xff]  ;;  %v2247_v51 = vpack.c.bf16 %v848_v39, %v844_v38  ;;  %v887_v38 = vld [vmem:[#allocation8 + $0xa18] sm:$0xff] }
 0x1a7   :  { %v2503_v52 = vpack.c.bf16 %v850_v45, %v846_v44  ;;  %v2249_v55 = vpack.c.bf16 %v857_v47, %v853_v46  ;;  %v891_v39 = vld [vmem:[#allocation8 + $0xa38] sm:$0xff]  ;;  %v884_v44 = vld [vmem:[#allocation8 + $0xa00] sm:$0xff]  ;;  %v914_v27 = vld [vmem:[#allocation8 + $0xaf0] sm:$0xff] }
 0x1a8   :  { %v888_v45 = vld [vmem:[#allocation8 + $0xa20] sm:$0xff]  ;;  %v2521_v47 = vpack.c.bf16 %v891_v39, %v887_v38  ;;  %v918_v38 = vld [vmem:[#allocation8 + $0xb10] sm:$0xff] }
 0x1a9   :  { %2232 = vmatpush1.bf16.msra.mxu0 %v2231_v56  ;;  %2488 = vmatpush1.bf16.msra.mxu1 %v2487_v57  ;;  %v2505_v56 = vpack.c.bf16 %v859_v50, %v855_v49  ;;  %v854_v57 = vld [vmem:[#allocation8 + $0x910] sm:$0xff] }
 0x1aa   :  { %2234 = vmatprep.subr.bf16.mxu0 %v2233_v30  ;;  %2490 = vmatprep.subr.bf16.mxu1 %v2489_v61  ;;  %v865_v30 = vld [vmem:[#allocation8 + $0x968] sm:$0xff]  ;;  %v863_v61 = vld [vmem:[#allocation8 + $0x958] sm:$0xff]  ;;  %v2507_v1 = vpack.c.bf16 %v858_v59, %v854_v57  ;;  %v886_v49 = vld [vmem:[#allocation8 + $0xa10] sm:$0xff] }
 0x1ab   :  { %v2253_v5 = vpack.c.bf16 %v865_v30, %v861_v60  ;;  %v2509_v14 = vpack.c.bf16 %v867_v62, %v863_v61  ;;  %v890_v50 = vld [vmem:[#allocation8 + $0xa30] sm:$0xff]  ;;  %v892_v57 = vld [vmem:[#allocation8 + $0xa40] sm:$0xff]  ;;  %v2525_v30 = vpack.c.bf16 %v899_v54, %v895_v53 }
 0x1ac   :  { %1234 = vmatmul.mubr.f32.vlgmr.msra.gmra.mrb[4].mxu0 %v558_v6  ;;  %1518 = vmatmul.mubr.f32.vlgmr.msra.gmra.mrb[4].mxu1 %v558_v6  ;;  %v862_v6 = vld [vmem:[#allocation8 + $0x950] sm:$0xff]  ;;  %v896_v59 = vld [vmem:[#allocation8 + $0xa60] sm:$0xff] }
 0x1ad   :  { %2236 = vmatpush1.bf16.msra.mxu0 %v2235_v58  ;;  %2492 = vmatpush1.bf16.msra.mxu1 %v2491_v7  ;;  %v866_v58 = vld [vmem:[#allocation8 + $0x970] sm:$0xff]  ;;  %v869_v7 = vld [vmem:[#allocation8 + $0x988] sm:$0xff] }
 0x1ae   :  { %2238 = vmatprep.subr.bf16.mxu0 %v2237_v11  ;;  %2494 = vmatprep.subr.bf16.mxu1 %v2493_v16  ;;  %v875_v11 = vld [vmem:[#allocation8 + $0x9b8] sm:$0xff]  ;;  %v2255_v16 = vpack.c.bf16 %v864_v3, %v860_v2  ;;  %v2511_v17 = vpack.c.bf16 %v866_v58, %v862_v6  ;;  %v2257_v20 = vpack.c.bf16 %v873_v8, %v869_v7  ;;  %v894_v61 = vld [vmem:[#allocation8 + $0xa50] sm:$0xff]  ;;  %v900_v6 = vld [vmem:[#allocation8 + $0xa80] sm:$0xff] }
 0x1af   :  { %1304 = vmatprep.mubr.f32.mxu0 %v561_v23  ;;  %1588 = vmatprep.mubr.f32.mxu1 %v561_v23  ;;  %v2513_v21 = vpack.c.bf16 %v875_v11, %v871_v9  ;;  %v874_v23 = vld [vmem:[#allocation8 + $0x9b0] sm:$0xff]  ;;  %v903_v2 = vld [vmem:[#allocation8 + $0xa98] sm:$0xff]  ;;  %v904_v58 = vld [vmem:[#allocation8 + $0xaa0] sm:$0xff] }
 0x1b0   :  { %v898_v62 = vld [vmem:[#allocation8 + $0xa70] sm:$0xff]  ;;  %v907_v3 = vld [vmem:[#allocation8 + $0xab8] sm:$0xff] }
 0x1b1   :  { %2240 = vmatpush1.bf16.msra.mxu0 %v2239_v10  ;;  %2496 = vmatpush1.bf16.msra.mxu1 %v2495_v25  ;;  %v877_v10 = vld [vmem:[#allocation8 + $0x9c8] sm:$0xff]  ;;  %v2529_v8 = vpack.c.bf16 %v907_v3, %v903_v2  ;;  %v902_v9 = vld [vmem:[#allocation8 + $0xa90] sm:$0xff] }
 0x1b2   :  { %2242 = vmatprep.subr.bf16.mxu0 %v2241_v28  ;;  %2498 = vmatprep.subr.bf16.mxu1 %v2497_v29  ;;  %v881_v25 = vld [vmem:[#allocation8 + $0x9e8] sm:$0xff]  ;;  %v2259_v28 = vpack.c.bf16 %v872_v19, %v868_v18  ;;  %v2515_v29 = vpack.c.bf16 %v874_v23, %v870_v22  ;;  %v906_v11 = vld [vmem:[#allocation8 + $0xab0] sm:$0xff]  ;;  %v911_v18 = vld [vmem:[#allocation8 + $0xad8] sm:$0xff] }
 0x1b3   :  { %v2261_v32 = vpack.c.bf16 %v881_v25, %v877_v10  ;;  %v915_v19 = vld [vmem:[#allocation8 + $0xaf8] sm:$0xff]  ;;  %v908_v22 = vld [vmem:[#allocation8 + $0xac0] sm:$0xff]  ;;  %v922_v39 = vld [vmem:[#allocation8 + $0xb30] sm:$0xff] }
 0x1b4   :  { %v912_v23 = vld [vmem:[#allocation8 + $0xae0] sm:$0xff]  ;;  %v2533_v25 = vpack.c.bf16 %v915_v19, %v911_v18  ;;  %v926_v53 = vld [vmem:[#allocation8 + $0xb50] sm:$0xff] }
 0x1b5   :  { %2244 = vmatpush1.bf16.msra.mxu0 %v2243_v36  ;;  %2500 = vmatpush1.bf16.msra.mxu1 %v2499_v37  ;;  %v885_v36 = vld [vmem:[#allocation8 + $0xa08] sm:$0xff]  ;;  %v930_v54 = vld [vmem:[#allocation8 + $0xb70] sm:$0xff]  ;;  %v940_v18 = vld [vmem:[#allocation8 + $0xbc0] sm:$0xff] }
 0x1b6   :  { %2246 = vmatprep.subr.bf16.mxu0 %v2245_v40  ;;  %2502 = vmatprep.subr.bf16.mxu1 %v2501_v42  ;;  %v889_v37 = vld [vmem:[#allocation8 + $0xa28] sm:$0xff]  ;;  %v2263_v40 = vpack.c.bf16 %v880_v0, %v876_v31  ;;  %v2519_v42 = vpack.c.bf16 %v882_v35, %v878_v34  ;;  %v919_v31 = vld [vmem:[#allocation8 + $0xb18] sm:$0xff]  ;;  %v916_v34 = vld [vmem:[#allocation8 + $0xb00] sm:$0xff] }
 0x1b7   :  { %v2265_v46 = vpack.c.bf16 %v889_v37, %v885_v36  ;;  %v923_v0 = vld [vmem:[#allocation8 + $0xb38] sm:$0xff]  ;;  %v920_v35 = vld [vmem:[#allocation8 + $0xb20] sm:$0xff]  ;;  %v934_v3 = vld [vmem:[#allocation8 + $0xb90] sm:$0xff] }
 0x1b8   :  { %v2537_v37 = vpack.c.bf16 %v923_v0, %v919_v31  ;;  %v944_v19 = vld [vmem:[#allocation8 + $0xbe0] sm:$0xff] }
 0x1b9   :  { %2248 = vmatpush1.bf16.msra.mxu0 %v2247_v51  ;;  %2504 = vmatpush1.bf16.msra.mxu1 %v2503_v52  ;;  %v893_v51 = vld [vmem:[#allocation8 + $0xa48] sm:$0xff]  ;;  %v2295_v31 = vpack.c.bf16 %v944_v19, %v940_v18  ;;  %v974_v18 = vld [vmem:[#allocation8 + $0xcd0] sm:$0xff] }
 0x1ba   :  { %2250 = vmatprep.subr.bf16.mxu0 %v2249_v55  ;;  %2506 = vmatprep.subr.bf16.mxu1 %v2505_v56  ;;  %v897_v52 = vld [vmem:[#allocation8 + $0xa68] sm:$0xff]  ;;  %v2267_v55 = vpack.c.bf16 %v888_v45, %v884_v44  ;;  %v2523_v56 = vpack.c.bf16 %v890_v50, %v886_v49  ;;  %v927_v44 = vld [vmem:[#allocation8 + $0xb58] sm:$0xff]  ;;  %v924_v49 = vld [vmem:[#allocation8 + $0xb40] sm:$0xff] }
 0x1bb   :  { %v2269_v60 = vpack.c.bf16 %v897_v52, %v893_v51  ;;  %v931_v45 = vld [vmem:[#allocation8 + $0xb78] sm:$0xff]  ;;  %v928_v50 = vld [vmem:[#allocation8 + $0xb60] sm:$0xff]  ;;  %v978_v19 = vld [vmem:[#allocation8 + $0xcf0] sm:$0xff] }
 0x1bc   :  { %v2541_v52 = vpack.c.bf16 %v931_v45, %v927_v44 }
 0x1bd   :  { %2252 = vmatpush1.bf16.msra.mxu0 %v2251_v63  ;;  %2508 = vmatpush1.bf16.msra.mxu1 %v2507_v1  ;;  %v901_v63 = vld [vmem:[#allocation8 + $0xa88] sm:$0xff] }
 0x1be   :  { %2254 = vmatprep.subr.bf16.mxu0 %v2253_v5  ;;  %2510 = vmatprep.subr.bf16.mxu1 %v2509_v14  ;;  %v905_v1 = vld [vmem:[#allocation8 + $0xaa8] sm:$0xff]  ;;  %v2271_v5 = vpack.c.bf16 %v896_v59, %v892_v57  ;;  %v2527_v14 = vpack.c.bf16 %v898_v62, %v894_v61  ;;  %v935_v57 = vld [vmem:[#allocation8 + $0xb98] sm:$0xff]  ;;  %v2543_v61 = vpack.c.bf16 %v930_v54, %v926_v53  ;;  %v932_v62 = vld [vmem:[#allocation8 + $0xb80] sm:$0xff] }
 0x1bf   :  { %v2273_v7 = vpack.c.bf16 %v905_v1, %v901_v63  ;;  %v939_v59 = vld [vmem:[#allocation8 + $0xbb8] sm:$0xff]  ;;  %v936_v63 = vld [vmem:[#allocation8 + $0xba0] sm:$0xff]  ;;  %v962_v53 = vld [vmem:[#allocation8 + $0xc70] sm:$0xff] }
 0x1c0   :  { %v2545_v2 = vpack.c.bf16 %v939_v59, %v935_v57  ;;  %v965_v54 = vld [vmem:[#allocation8 + $0xc88] sm:$0xff]  ;;  %v971_v57 = vld [vmem:[#allocation8 + $0xcb8] sm:$0xff] }
 0x1c1   :  { %2256 = vmatpush1.bf16.msra.mxu0 %v2255_v16  ;;  %2512 = vmatpush1.bf16.msra.mxu1 %v2511_v17  ;;  %v909_v16 = vld [vmem:[#allocation8 + $0xac8] sm:$0xff] }
 0x1c2   :  { %2258 = vmatprep.subr.bf16.mxu0 %v2257_v20  ;;  %2514 = vmatprep.subr.bf16.mxu1 %v2513_v21  ;;  %v913_v17 = vld [vmem:[#allocation8 + $0xae8] sm:$0xff]  ;;  %v2275_v20 = vpack.c.bf16 %v904_v58, %v900_v6  ;;  %v2531_v21 = vpack.c.bf16 %v906_v11, %v902_v9  ;;  %v943_v58 = vld [vmem:[#allocation8 + $0xbd8] sm:$0xff] }
 0x1c3   :  { %v2277_v10 = vpack.c.bf16 %v913_v17, %v909_v16  ;;  %v945_v6 = vld [vmem:[#allocation8 + $0xbe8] sm:$0xff]  ;;  %v3048_v9 = vld [vmem:[#allocation7] sm:$0xff]  ;;  %v2291_v16 = vpack.c.bf16 %v936_v63, %v932_v62 }
 0x1c5   :  { %2260 = vmatpush1.bf16.msra.mxu0 %v2259_v28  ;;  %2516 = vmatpush1.bf16.msra.mxu1 %v2515_v29  ;;  %v917_v28 = vld [vmem:[#allocation8 + $0xb08] sm:$0xff] }
 0x1c6   :  { %2262 = vmatprep.subr.bf16.mxu0 %v2261_v32  ;;  %2518 = vmatprep.subr.bf16.mxu1 %v2517_v33  ;;  %v921_v29 = vld [vmem:[#allocation8 + $0xb28] sm:$0xff]  ;;  %v2279_v32 = vpack.c.bf16 %v912_v23, %v908_v22  ;;  %v2535_v33 = vpack.c.bf16 %v914_v27, %v910_v26  ;;  %v942_v22 = vld [vmem:[#allocation8 + $0xbd0] sm:$0xff]  ;;  %v951_v26 = vld [vmem:[#allocation8 + $0xc18] sm:$0xff] }
 0x1c7   :  { %v2281_v36 = vpack.c.bf16 %v921_v29, %v917_v28  ;;  %v946_v23 = vld [vmem:[#allocation8 + $0xbf0] sm:$0xff]  ;;  %v955_v27 = vld [vmem:[#allocation8 + $0xc38] sm:$0xff] }
 0x1c8   :  { %v2551_v0 = vpack.c.bf16 %v946_v23, %v942_v22  ;;  %v983_v22 = vld [vmem:[#allocation8 + $0xd18] sm:$0xff] }
 0x1c9   :  { %2264 = vmatpush1.bf16.msra.mxu0 %v2263_v40  ;;  %2520 = vmatpush1.bf16.msra.mxu1 %v2519_v42  ;;  %v925_v40 = vld [vmem:[#allocation8 + $0xb48] sm:$0xff]  ;;  %v987_v23 = vld [vmem:[#allocation8 + $0xd38] sm:$0xff] }
 0x1ca   :  { %2266 = vmatprep.subr.bf16.mxu0 %v2265_v46  ;;  %2522 = vmatprep.subr.bf16.mxu1 %v2521_v47  ;;  %v929_v42 = vld [vmem:[#allocation8 + $0xb68] sm:$0xff]  ;;  %v2283_v46 = vpack.c.bf16 %v920_v35, %v916_v34  ;;  %v2539_v47 = vpack.c.bf16 %v922_v39, %v918_v38  ;;  %v2553_v35 = vpack.c.bf16 %v955_v27, %v951_v26  ;;  %v980_v26 = vld [vmem:[#allocation8 + $0xd00] sm:$0xff] }
 0x1cb   :  { %v2285_v51 = vpack.c.bf16 %v929_v42, %v925_v40  ;;  %v957_v38 = vld [vmem:[#allocation8 + $0xc48] sm:$0xff]  ;;  %v959_v40 = vld [vmem:[#allocation8 + $0xc58] sm:$0xff]  ;;  %v984_v27 = vld [vmem:[#allocation8 + $0xd20] sm:$0xff] }
 0x1cc   :  { %v961_v39 = vld [vmem:[#allocation8 + $0xc68] sm:$0xff]  ;;  %v963_v42 = vld [vmem:[#allocation8 + $0xc78] sm:$0xff] }
 0x1cd   :  { %2268 = vmatpush1.bf16.msra.mxu0 %v2267_v55  ;;  %2524 = vmatpush1.bf16.msra.mxu1 %v2523_v56  ;;  %v933_v55 = vld [vmem:[#allocation8 + $0xb88] sm:$0xff] }
 0x1ce   :  { %2270 = vmatprep.subr.bf16.mxu0 %v2269_v60  ;;  %2526 = vmatprep.subr.bf16.mxu1 %v2525_v30  ;;  %v937_v56 = vld [vmem:[#allocation8 + $0xba8] sm:$0xff]  ;;  %v250_v60 = vsub.s32 4, %v3012_v12  ;;  %v2287_v30 = vpack.c.bf16 %v928_v50, %v924_v49  ;;  %v960_v49 = vld [vmem:[#allocation8 + $0xc60] sm:$0xff]  ;;  %v2301_v50 = vpack.c.bf16 %v961_v39, %v957_v38 }
 0x1cf   :  { %v2289_v1 = vpack.c.bf16 %v937_v56, %v933_v55  ;;  %v969_v55 = vld [vmem:[#allocation8 + $0xca8] sm:$0xff]  ;;  %v967_v56 = vld [vmem:[#allocation8 + $0xc98] sm:$0xff]  ;;  %v988_v38 = vld [vmem:[#allocation8 + $0xd40] sm:$0xff] }
 0x1d0   :  { %v251_v11 = vrot.slane %v3048_v9, %v250_v60  ;;  %v2305_v62 = vpack.c.bf16 %v969_v55, %v965_v54  ;;  %v2561_v63 = vpack.c.bf16 %v971_v57, %v967_v56  ;;  %v992_v39 = vld [vmem:[#allocation8 + $0xd60] sm:$0xff]  ;;  %v998_v56 = vld [vmem:[#allocation8 + $0xd90] sm:$0xff] }
 0x1d1   :  { %2272 = vmatpush1.bf16.msra.mxu0 %v2271_v5  ;;  %2528 = vmatpush1.bf16.msra.mxu1 %v2527_v14  ;;  %v938_v5 = vld [vmem:[#allocation8 + $0xbb0] sm:$0xff]  ;;  %v941_v14 = vld [vmem:[#allocation8 + $0xbc8] sm:$0xff] }
 0x1d2   :  { %2274 = vmatprep.subr.bf16.mxu0 %v2273_v7  ;;  %2530 = vmatprep.subr.bf16.mxu1 %v2529_v8  ;;  %v947_v7 = vld [vmem:[#allocation8 + $0xbf8] sm:$0xff]  ;;  %v262_v8 = vsub.s32 7, %v3012_v12  ;;  %v2547_v17 = vpack.c.bf16 %v938_v5, %v934_v3  ;;  %v481_v29 = vadd.f32 %v3030_v4, %v251_v11  ;;  %v973_v3 = vld [vmem:[#allocation8 + $0xcc8] sm:$0xff]  ;;  %v976_v11 = vld [vmem:[#allocation8 + $0xce0] sm:$0xff] }
 0x1d3   :  { %v977_v5 = vld [vmem:[#allocation8 + $0xce8] sm:$0xff]  ;;  %v1002_v57 = vld [vmem:[#allocation8 + $0xdb0] sm:$0xff] }
 0x1d4   :  { %v263_v28 = vrot.slane %v3048_v9, %v262_v8  ;;  %v560_v45 = vmax.f32 %v481_v29, 0.0  ;;  %v972_v8 = vld [vmem:[#allocation8 + $0xcc0] sm:$0xff]  ;;  %v2569_v29 = vpack.c.bf16 %v987_v23, %v983_v22  ;;  %v1018_v22 = vld [vmem:[#allocation8 + $0xe30] sm:$0xff]  ;;  %v1021_v23 = vld [vmem:[#allocation8 + $0xe48] sm:$0xff] }
 0x1d5   :  { %2276 = vmatpush1.bf16.msra.mxu0 %v2275_v20  ;;  %2532 = vmatpush1.bf16.msra.mxu1 %v2531_v21  ;;  %v2293_v20 = vpack.c.bf16 %v945_v6, %v941_v14  ;;  %v2549_v21 = vpack.c.bf16 %v947_v7, %v943_v58  ;;  %v975_v14 = vld [vmem:[#allocation8 + $0xcd8] sm:$0xff] }
 0x1d6   :  { %2278 = vmatprep.subr.bf16.mxu0 %v2277_v10  ;;  %2534 = vmatprep.subr.bf16.mxu1 %v2533_v25  ;;  %v949_v10 = vld [vmem:[#allocation8 + $0xc08] sm:$0xff]  ;;  %v554_v44 = vadd.f32 %v3036_v48, %v263_v28  ;;  %v979_v6 = vld [vmem:[#allocation8 + $0xcf8] sm:$0xff] }
 0x1d7   :  { %v953_v25 = vld [vmem:[#allocation8 + $0xc28] sm:$0xff] }
 0x1d8   :  { %v2297_v34 = vpack.c.bf16 %v953_v25, %v949_v10  ;;  %v563_v59 = vmax.f32 %v554_v44, 0.0  ;;  %v2311_v10 = vpack.c.bf16 %v976_v11, %v972_v8  ;;  %v2567_v25 = vpack.c.bf16 %v978_v19, %v974_v18  ;;  %v990_v44 = vld [vmem:[#allocation8 + $0xd50] sm:$0xff]  ;;  %v1019_v8 = vld [vmem:[#allocation8 + $0xe38] sm:$0xff]  ;;  %v1016_v18 = vld [vmem:[#allocation8 + $0xe20] sm:$0xff] }
 0x1d9   :  { %2280 = vmatpush1.bf16.msra.mxu0 %v2279_v32  ;;  %2536 = vmatpush1.bf16.msra.mxu1 %v2535_v33  ;;  %v948_v32 = vld [vmem:[#allocation8 + $0xc00] sm:$0xff] }
 0x1da   :  { %2282 = vmatprep.subr.bf16.mxu0 %v2281_v36  ;;  %2538 = vmatprep.subr.bf16.mxu1 %v2537_v37  ;;  %v952_v33 = vld [vmem:[#allocation8 + $0xc20] sm:$0xff]  ;;  %v950_v36 = vld [vmem:[#allocation8 + $0xc10] sm:$0xff] }
 0x1db   :  { %v954_v37 = vld [vmem:[#allocation8 + $0xc30] sm:$0xff]  ;;  %v2299_v4 = vpack.c.bf16 %v952_v33, %v948_v32  ;;  %v989_v32 = vld [vmem:[#allocation8 + $0xd48] sm:$0xff] }
 0x1dc   :  { %v993_v33 = vld [vmem:[#allocation8 + $0xd68] sm:$0xff] }
 0x1dd   :  { %2284 = vmatpush1.bf16.msra.mxu0 %v2283_v46  ;;  %2540 = vmatpush1.bf16.msra.mxu1 %v2539_v47  ;;  %v2555_v46 = vpack.c.bf16 %v954_v37, %v950_v36  ;;  %v956_v47 = vld [vmem:[#allocation8 + $0xc40] sm:$0xff]  ;;  %v2315_v36 = vpack.c.bf16 %v984_v27, %v980_v26  ;;  %v1027_v26 = vld [vmem:[#allocation8 + $0xe78] sm:$0xff] }
 0x1de   :  { %2286 = vmatprep.subr.bf16.mxu0 %v2285_v51  ;;  %2542 = vmatprep.subr.bf16.mxu1 %v2541_v52  ;;  %v2557_v51 = vpack.c.bf16 %v963_v42, %v959_v40  ;;  %v958_v52 = vld [vmem:[#allocation8 + $0xc50] sm:$0xff]  ;;  %v2303_v48 = vpack.c.bf16 %v960_v49, %v956_v47  ;;  %v2317_v40 = vpack.c.bf16 %v993_v33, %v989_v32  ;;  %v999_v47 = vld [vmem:[#allocation8 + $0xd98] sm:$0xff] }
 0x1df   :  { %v2559_v60 = vpack.c.bf16 %v962_v53, %v958_v52  ;;  %v1003_v49 = vld [vmem:[#allocation8 + $0xdb8] sm:$0xff]  ;;  %v996_v52 = vld [vmem:[#allocation8 + $0xd80] sm:$0xff]  ;;  %v1022_v33 = vld [vmem:[#allocation8 + $0xe50] sm:$0xff] }
 0x1e0   :  { %v1000_v53 = vld [vmem:[#allocation8 + $0xda0] sm:$0xff]  ;;  %v2577_v55 = vpack.c.bf16 %v1003_v49, %v999_v47  ;;  %v1034_v47 = vld [vmem:[#allocation8 + $0xeb0] sm:$0xff]  ;;  %v1037_v49 = vld [vmem:[#allocation8 + $0xec8] sm:$0xff] }
 0x1e1   :  { %2288 = vmatpush1.bf16.msra.mxu0 %v2287_v30  ;;  %2544 = vmatpush1.bf16.msra.mxu1 %v2543_v61  ;;  %v964_v30 = vld [vmem:[#allocation8 + $0xc80] sm:$0xff] }
 0x1e2   :  { %2290 = vmatprep.subr.bf16.mxu0 %v2289_v1  ;;  %2546 = vmatprep.subr.bf16.mxu1 %v2545_v2  ;;  %v968_v61 = vld [vmem:[#allocation8 + $0xca0] sm:$0xff]  ;;  %v966_v1 = vld [vmem:[#allocation8 + $0xc90] sm:$0xff] }
 0x1e3   :  { %v970_v2 = vld [vmem:[#allocation8 + $0xcb0] sm:$0xff]  ;;  %v2307_v58 = vpack.c.bf16 %v968_v61, %v964_v30  ;;  %v1011_v30 = vld [vmem:[#allocation8 + $0xdf8] sm:$0xff]  ;;  %v2323_v61 = vpack.c.bf16 %v1000_v53, %v996_v52 }
 0x1e4   :  { %v2563_v7 = vpack.c.bf16 %v970_v2, %v966_v1  ;;  %v1008_v1 = vld [vmem:[#allocation8 + $0xde0] sm:$0xff]  ;;  %v1043_v52 = vld [vmem:[#allocation8 + $0xef8] sm:$0xff] }
 0x1e5   :  { %2292 = vmatpush1.bf16.msra.mxu0 %v2291_v16  ;;  %2548 = vmatpush1.bf16.msra.mxu1 %v2547_v17  ;;  %v2309_v16 = vpack.c.bf16 %v977_v5, %v973_v3  ;;  %v2565_v17 = vpack.c.bf16 %v979_v6, %v975_v14  ;;  %v1006_v5 = vld [vmem:[#allocation8 + $0xdd0] sm:$0xff]  ;;  %v1013_v6 = vld [vmem:[#allocation8 + $0xe08] sm:$0xff] }
 0x1e6   :  { %2294 = vmatprep.subr.bf16.mxu0 %v2293_v20  ;;  %2550 = vmatprep.subr.bf16.mxu1 %v2549_v21  ;;  %v981_v20 = vld [vmem:[#allocation8 + $0xd08] sm:$0xff]  ;;  %v1010_v14 = vld [vmem:[#allocation8 + $0xdf0] sm:$0xff] }
 0x1e7   :  { %v985_v21 = vld [vmem:[#allocation8 + $0xd28] sm:$0xff] }
 0x1e8   :  { %v2313_v28 = vpack.c.bf16 %v985_v21, %v981_v20  ;;  %v1014_v21 = vld [vmem:[#allocation8 + $0xe10] sm:$0xff] }
 0x1e9   :  { %2296 = vmatpush1.bf16.msra.mxu0 %v2295_v31  ;;  %2552 = vmatpush1.bf16.msra.mxu1 %v2551_v0  ;;  %v982_v31 = vld [vmem:[#allocation8 + $0xd10] sm:$0xff] }
 0x1ea   :  { %2298 = vmatprep.subr.bf16.mxu0 %v2297_v34  ;;  %2554 = vmatprep.subr.bf16.mxu1 %v2553_v35  ;;  %v986_v0 = vld [vmem:[#allocation8 + $0xd30] sm:$0xff]  ;;  %v991_v34 = vld [vmem:[#allocation8 + $0xd58] sm:$0xff] }
 0x1eb   :  { %v995_v35 = vld [vmem:[#allocation8 + $0xd78] sm:$0xff]  ;;  %v2571_v37 = vpack.c.bf16 %v986_v0, %v982_v31  ;;  %v1024_v31 = vld [vmem:[#allocation8 + $0xe60] sm:$0xff] }
 0x1ec   :  { %1305 = vmatmul.mubr.f32.vlgmr.msra.gmra.mrb[4].mxu0 %v560_v45  ;;  %1589 = vmatmul.mubr.f32.vlgmr.msra.gmra.mrb[4].mxu1 %v560_v45  ;;  %v2573_v42 = vpack.c.bf16 %v995_v35, %v991_v34  ;;  %v994_v45 = vld [vmem:[#allocation8 + $0xd70] sm:$0xff]  ;;  %v1029_v35 = vld [vmem:[#allocation8 + $0xe88] sm:$0xff] }
 0x1ed   :  { %2300 = vmatpush1.bf16.msra.mxu0 %v2299_v4  ;;  %2556 = vmatpush1.bf16.msra.mxu1 %v2555_v46  ;;  %v997_v4 = vld [vmem:[#allocation8 + $0xd88] sm:$0xff]  ;;  %v1026_v34 = vld [vmem:[#allocation8 + $0xe70] sm:$0xff] }
 0x1ee   :  { %2302 = vmatprep.subr.bf16.mxu0 %v2301_v50  ;;  %2558 = vmatprep.subr.bf16.mxu1 %v2557_v51  ;;  %v1001_v46 = vld [vmem:[#allocation8 + $0xda8] sm:$0xff]  ;;  %v2319_v50 = vpack.c.bf16 %v992_v39, %v988_v38  ;;  %v2575_v51 = vpack.c.bf16 %v994_v45, %v990_v44  ;;  %v1035_v38 = vld [vmem:[#allocation8 + $0xeb8] sm:$0xff]  ;;  %v1032_v44 = vld [vmem:[#allocation8 + $0xea0] sm:$0xff] }
 0x1ef   :  { %1375 = vmatprep.mubr.f32.mxu0 %v563_v59  ;;  %1659 = vmatprep.mubr.f32.mxu1 %v563_v59  ;;  %v2321_v54 = vpack.c.bf16 %v1001_v46, %v997_v4  ;;  %v1005_v59 = vld [vmem:[#allocation8 + $0xdc8] sm:$0xff]  ;;  %v1030_v46 = vld [vmem:[#allocation8 + $0xe90] sm:$0xff] }
 0x1f1   :  { %2304 = vmatpush1.bf16.msra.mxu0 %v2303_v48  ;;  %2560 = vmatpush1.bf16.msra.mxu1 %v2559_v60  ;;  %v1009_v48 = vld [vmem:[#allocation8 + $0xde8] sm:$0xff]  ;;  %v1007_v60 = vld [vmem:[#allocation8 + $0xdd8] sm:$0xff] }
 0x1f2   :  { %2306 = vmatprep.subr.bf16.mxu0 %v2305_v62  ;;  %2562 = vmatprep.subr.bf16.mxu1 %v2561_v63  ;;  %v2579_v62 = vpack.c.bf16 %v1002_v57, %v998_v56  ;;  %v1004_v63 = vld [vmem:[#allocation8 + $0xdc0] sm:$0xff]  ;;  %v2325_v2 = vpack.c.bf16 %v1009_v48, %v1005_v59  ;;  %v2581_v3 = vpack.c.bf16 %v1011_v30, %v1007_v60  ;;  %v1038_v48 = vld [vmem:[#allocation8 + $0xed0] sm:$0xff]  ;;  %v1045_v30 = vld [vmem:[#allocation8 + $0xf08] sm:$0xff] }
 0x1f3   :  { %v2327_v11 = vpack.c.bf16 %v1008_v1, %v1004_v63  ;;  %v1040_v56 = vld [vmem:[#allocation8 + $0xee0] sm:$0xff]  ;;  %v1042_v60 = vld [vmem:[#allocation8 + $0xef0] sm:$0xff]  ;;  %v1051_v63 = vld [vmem:[#allocation8 + $0xf38] sm:$0xff] }
 0x1f5   :  { %2308 = vmatpush1.bf16.msra.mxu0 %v2307_v58  ;;  %2564 = vmatpush1.bf16.msra.mxu1 %v2563_v7  ;;  %v1017_v58 = vld [vmem:[#allocation8 + $0xe28] sm:$0xff]  ;;  %v1015_v7 = vld [vmem:[#allocation8 + $0xe18] sm:$0xff] }
 0x1f6   :  { %2310 = vmatprep.subr.bf16.mxu0 %v2309_v16  ;;  %2566 = vmatprep.subr.bf16.mxu1 %v2565_v17  ;;  %v2583_v16 = vpack.c.bf16 %v1010_v14, %v1006_v5  ;;  %v1012_v17 = vld [vmem:[#allocation8 + $0xe00] sm:$0xff]  ;;  %v2329_v19 = vpack.c.bf16 %v1017_v58, %v1013_v6  ;;  %v2585_v20 = vpack.c.bf16 %v1019_v8, %v1015_v7  ;;  %v1046_v58 = vld [vmem:[#allocation8 + $0xf10] sm:$0xff]  ;;  %v1053_v8 = vld [vmem:[#allocation8 + $0xf48] sm:$0xff] }
 0x1f7   :  { %v2331_v27 = vpack.c.bf16 %v1016_v18, %v1012_v17  ;;  %v1048_v5 = vld [vmem:[#allocation8 + $0xf20] sm:$0xff]  ;;  %v1050_v7 = vld [vmem:[#allocation8 + $0xf30] sm:$0xff]  ;;  %v1059_v17 = vld [vmem:[#allocation8 + $0xf78] sm:$0xff] }
 0x1f9   :  { %2312 = vmatpush1.bf16.msra.mxu0 %v2311_v10  ;;  %2568 = vmatpush1.bf16.msra.mxu1 %v2567_v25  ;;  %v1025_v10 = vld [vmem:[#allocation8 + $0xe68] sm:$0xff]  ;;  %v1023_v25 = vld [vmem:[#allocation8 + $0xe58] sm:$0xff] }
 0x1fa   :  { %2314 = vmatprep.subr.bf16.mxu0 %v2313_v28  ;;  %2570 = vmatprep.subr.bf16.mxu1 %v2569_v29  ;;  %v2587_v28 = vpack.c.bf16 %v1018_v22, %v1014_v21  ;;  %v1020_v29 = vld [vmem:[#allocation8 + $0xe40] sm:$0xff]  ;;  %v2333_v0 = vpack.c.bf16 %v1025_v10, %v1021_v23  ;;  %v2589_v32 = vpack.c.bf16 %v1027_v26, %v1023_v25  ;;  %v1054_v10 = vld [vmem:[#allocation8 + $0xf50] sm:$0xff]  ;;  %v1061_v26 = vld [vmem:[#allocation8 + $0xf88] sm:$0xff] }
 0x1fb   :  { %v2335_v39 = vpack.c.bf16 %v1024_v31, %v1020_v29  ;;  %v1056_v21 = vld [vmem:[#allocation8 + $0xf60] sm:$0xff]  ;;  %v1058_v25 = vld [vmem:[#allocation8 + $0xf70] sm:$0xff]  ;;  %v1067_v29 = vld [vmem:[#allocation8 + $0xfb8] sm:$0xff] }
 0x1fd   :  { %2316 = vmatpush1.bf16.msra.mxu0 %v2315_v36  ;;  %2572 = vmatpush1.bf16.msra.mxu1 %v2571_v37  ;;  %v1033_v36 = vld [vmem:[#allocation8 + $0xea8] sm:$0xff]  ;;  %v1031_v37 = vld [vmem:[#allocation8 + $0xe98] sm:$0xff] }
 0x1fe   :  { %2318 = vmatprep.subr.bf16.mxu0 %v2317_v40  ;;  %2574 = vmatprep.subr.bf16.mxu1 %v2573_v42  ;;  %v2591_v40 = vpack.c.bf16 %v1026_v34, %v1022_v33  ;;  %v1028_v42 = vld [vmem:[#allocation8 + $0xe80] sm:$0xff]  ;;  %v2337_v45 = vpack.c.bf16 %v1033_v36, %v1029_v35  ;;  %v2593_v4 = vpack.c.bf16 %v1035_v38, %v1031_v37  ;;  %v258_v34 = vsub.s32 6, %v3012_v12  ;;  %v1062_v37 = vld [vmem:[#allocation8 + $0xf90] sm:$0xff] }
 0x1ff   :  { %v2339_v53 = vpack.c.bf16 %v1032_v44, %v1028_v42  ;;  %v1064_v33 = vld [vmem:[#allocation8 + $0xfa0] sm:$0xff]  ;;  %v1066_v38 = vld [vmem:[#allocation8 + $0xfb0] sm:$0xff]  ;;  %v1071_v42 = vld [vmem:[#allocation8 + $0xfd8] sm:$0xff] }
 0x200   :  { %v1075_v44 = vld [vmem:[#allocation8 + $0xff8] sm:$0xff]  ;;  %v1906_v12 = vld [vmem:[#allocation11] ss:$0 sm:$0xff] }
 0x201   :  { %2320 = vmatpush1.bf16.msra.mxu0 %v2319_v50  ;;  %2576 = vmatpush1.bf16.msra.mxu1 %v2575_v51  ;;  %v1041_v50 = vld [vmem:[#allocation8 + $0xee8] sm:$0xff]  ;;  %v1039_v51 = vld [vmem:[#allocation8 + $0xed8] sm:$0xff] }
 0x202   :  { %2322 = vmatprep.subr.bf16.mxu0 %v2321_v54  ;;  %2578 = vmatprep.subr.bf16.mxu1 %v2577_v55  ;;  %v2595_v54 = vpack.c.bf16 %v1034_v47, %v1030_v46  ;;  %v1036_v55 = vld [vmem:[#allocation8 + $0xec0] sm:$0xff]  ;;  %v2341_v57 = vpack.c.bf16 %v1041_v50, %v1037_v49  ;;  %v2597_v59 = vpack.c.bf16 %v1043_v52, %v1039_v51  ;;  %v1070_v52 = vld [vmem:[#allocation8 + $0xfd0] sm:$0xff] }
 0x203   :  { %v2343_v1 = vpack.c.bf16 %v1040_v56, %v1036_v55  ;;  %v1068_v46 = vld [vmem:[#allocation8 + $0xfc0] sm:$0xff]  ;;  %v259_v49 = vrot.slane %v3048_v9, %v258_v34  ;;  %v2613_v51 = vpack.c.bf16 %v1075_v44, %v1071_v42  ;;  %v1687_v55 = vld [vmem:[%s3274_s5 + $0x88] sm:$0xff]  ;;  %v1718_v56 = vld [vmem:[%s3274_s5 + $0x180] sm:$0xff] }
 0x204   :  { %v1072_v47 = vld [vmem:[#allocation8 + $0xfe0] sm:$0xff]  ;;  %v1719_v9 = vld [vmem:[%s3274_s5 + $0x188] sm:$0xff]  ;;  %v1725_v34 = vld [vmem:[%s3274_s5 + $0x1b8] sm:$0xff] }
 0x205   :  { %2324 = vmatpush1.bf16.msra.mxu0 %v2323_v61  ;;  %2580 = vmatpush1.bf16.msra.mxu1 %v2579_v62  ;;  %v1049_v61 = vld [vmem:[#allocation8 + $0xf28] sm:$0xff]  ;;  %v1047_v62 = vld [vmem:[#allocation8 + $0xf18] sm:$0xff]  ;;  %v1708_v42 = vld [vmem:[%s3274_s5 + $0x130] sm:$0xff] }
 0x206   :  { %2326 = vmatprep.subr.bf16.mxu0 %v2325_v2  ;;  %2582 = vmatprep.subr.bf16.mxu1 %v2581_v3  ;;  %v2599_v2 = vpack.c.bf16 %v1042_v60, %v1038_v48  ;;  %v1044_v3 = vld [vmem:[#allocation8 + $0xf00] sm:$0xff]  ;;  %v2345_v14 = vpack.c.bf16 %v1049_v61, %v1045_v30  ;;  %v2601_v6 = vpack.c.bf16 %v1051_v63, %v1047_v62  ;;  %v1670_v48 = vld [vmem:[%s3274_s5] sm:$0xff]  ;;  %v1671_v60 = vld [vmem:[%s3274_s5 + $0x8] sm:$0xff] }
 0x207   :  { %v2347_v18 = vpack.c.bf16 %v1048_v5, %v1044_v3  ;;  %v552_v30 = vadd.f32 %v3034_v43, %v259_v49  ;;  %v2649_v62 = vpack.c.bf16 %v1719_v9, %v1718_v56  ;;  %v1702_v63 = vld [vmem:[%s3274_s5 + $0x100] sm:$0xff]  ;;  %v1689_v43 = vld [vmem:[%s3274_s5 + $0x98] sm:$0xff]  ;;  %v1720_v3 = vld [vmem:[%s3274_s5 + $0x190] sm:$0xff] }
 0x208   :  { %v1721_v5 = vld [vmem:[%s3274_s5 + $0x198] sm:$0xff]  ;;  %v1711_v56 = vld [vmem:[%s3274_s5 + $0x148] sm:$0xff]  ;;  %v1696_v9 = vld [vmem:[%s3274_s5 + $0xd0] sm:$0xff] }
 0x209   :  { %2328 = vmatpush1.bf16.msra.mxu0 %v2327_v11  ;;  %2584 = vmatpush1.bf16.msra.mxu1 %v2583_v16  ;;  %v1057_v11 = vld [vmem:[#allocation8 + $0xf68] sm:$0xff]  ;;  %v1055_v16 = vld [vmem:[#allocation8 + $0xf58] sm:$0xff] }
 0x20a   :  { %2330 = vmatprep.subr.bf16.mxu0 %v2329_v19  ;;  %2586 = vmatprep.subr.bf16.mxu1 %v2585_v20  ;;  %v2603_v19 = vpack.c.bf16 %v1050_v7, %v1046_v58  ;;  %v1052_v20 = vld [vmem:[#allocation8 + $0xf40] sm:$0xff]  ;;  %v2349_v22 = vpack.c.bf16 %v1057_v11, %v1053_v8  ;;  %v2605_v23 = vpack.c.bf16 %v1059_v17, %v1055_v16  ;;  %v1673_v7 = vld [vmem:[%s3274_s5 + $0x18] sm:$0xff]  ;;  %v562_v8 = vmax.f32 %v552_v30, 0.0 }
 0x20b   :  { %v2351_v31 = vpack.c.bf16 %v1056_v21, %v1052_v20  ;;  %v1672_v58 = vld [vmem:[%s3274_s5 + $0x10] sm:$0xff]  ;;  %v2653_v16 = vpack.c.bf16 %v1721_v5, %v1720_v3  ;;  %v1691_v20 = vld [vmem:[%s3274_s5 + $0xa8] sm:$0xff]  ;;  %v1722_v21 = vld [vmem:[%s3274_s5 + $0x1a0] sm:$0xff] }
 0x20c   :  { %v1704_v17 = vld [vmem:[%s3274_s5 + $0x110] sm:$0xff]  ;;  %v1709_v44 = vld [vmem:[%s3274_s5 + $0x138] sm:$0xff]  ;;  %v1698_v3 = vld [vmem:[%s3274_s5 + $0xe0] sm:$0xff] }
 0x20d   :  { %2332 = vmatpush1.bf16.msra.mxu0 %v2331_v27  ;;  %2588 = vmatpush1.bf16.msra.mxu1 %v2587_v28  ;;  %v1065_v27 = vld [vmem:[#allocation8 + $0xfa8] sm:$0xff]  ;;  %v1063_v28 = vld [vmem:[#allocation8 + $0xf98] sm:$0xff] }
 0x20e   :  { %2334 = vmatprep.subr.bf16.mxu0 %v2333_v0  ;;  %2590 = vmatprep.subr.bf16.mxu1 %v2589_v32  ;;  %v2607_v0 = vpack.c.bf16 %v1058_v25, %v1054_v10  ;;  %v1060_v32 = vld [vmem:[#allocation8 + $0xf80] sm:$0xff]  ;;  %v2353_v35 = vpack.c.bf16 %v1065_v27, %v1061_v26  ;;  %v2609_v36 = vpack.c.bf16 %v1067_v29, %v1063_v28  ;;  %v1674_v25 = vld [vmem:[%s3274_s5 + $0x20] sm:$0xff]  ;;  %v1675_v26 = vld [vmem:[%s3274_s5 + $0x28] sm:$0xff] }
 0x20f   :  { %v1706_v29 = vld [vmem:[%s3274_s5 + $0x120] sm:$0xff]  ;;  %v1699_v5 = vld [vmem:[%s3274_s5 + $0xe8] sm:$0xff] }
 0x211   :  { %2336 = vmatpush1.bf16.msra.mxu0 %v2335_v39  ;;  %2592 = vmatpush1.bf16.msra.mxu1 %v2591_v40  ;;  %v1069_v39 = vld [vmem:[#allocation8 + $0xfc8] sm:$0xff] }
 0x212   :  { %2338 = vmatprep.subr.bf16.mxu0 %v2337_v45  ;;  %2594 = vmatprep.subr.bf16.mxu1 %v2593_v4  ;;  %v1073_v40 = vld [vmem:[#allocation8 + $0xfe8] sm:$0xff]  ;;  %v2355_v45 = vpack.c.bf16 %v1064_v33, %v1060_v32  ;;  %v2611_v4 = vpack.c.bf16 %v1066_v38, %v1062_v37  ;;  %v1724_v33 = vld [vmem:[%s3274_s5 + $0x1b0] sm:$0xff] }
 0x213   :  { %v2357_v50 = vpack.c.bf16 %v1073_v40, %v1069_v39  ;;  %v1693_v32 = vld [vmem:[%s3274_s5 + $0xb8] sm:$0xff]  ;;  %v1676_v37 = vld [vmem:[%s3274_s5 + $0x30] sm:$0xff]  ;;  %v2661_v40 = vpack.c.bf16 %v1725_v34, %v1724_v33 }
 0x214   :  { %v1677_v38 = vld [vmem:[%s3274_s5 + $0x38] sm:$0xff]  ;;  %v1076_v34 = vld [vmem:[#allocation10] sm:$0xf] }
 0x215   :  { %2340 = vmatpush1.bf16.msra.mxu0 %v2339_v53  ;;  %2596 = vmatpush1.bf16.msra.mxu1 %v2595_v54  ;;  %v1074_v53 = vld [vmem:[#allocation8 + $0xff0] sm:$0xff]  ;;  %v2631_v49 = vpack.c.bf16 %v1677_v38, %v1676_v37  ;;  %v1085_v37 = vrot.slane %v1076_v34, %v238_v15  ;;  %v1093_v38 = vrot.slane %v1076_v34, %v246_v41 }
 0x216   :  { %2342 = vmatprep.subr.bf16.mxu0 %v2341_v57  ;;  %2598 = vmatprep.subr.bf16.mxu1 %v2597_v59  ;;  %v1686_v54 = vld [vmem:[%s3274_s5 + $0x80] sm:$0xff]  ;;  %v2359_v57 = vpack.c.bf16 %v1072_v47, %v1068_v46  ;;  %v2615_v59 = vpack.c.bf16 %v1074_v53, %v1070_v52  ;;  %v1727_v47 = vld [vmem:[%s3274_s5 + $0x1c8] sm:$0xff] }
 0x217   :  { %v2617_v61 = vpack.c.bf16 %v1687_v55, %v1686_v54  ;;  %v1726_v46 = vld [vmem:[%s3274_s5 + $0x1c0] sm:$0xff]  ;;  %v1679_v52 = vld [vmem:[%s3274_s5 + $0x48] sm:$0xff] }
 0x218   :  { %v2665_v54 = vpack.c.bf16 %v1727_v47, %v1726_v46  ;;  %v1710_v55 = vld [vmem:[%s3274_s5 + $0x140] sm:$0xff] }
 0x219   :  { %2344 = vmatpush1.bf16.msra.mxu0 %v2343_v1  ;;  %2600 = vmatpush1.bf16.msra.mxu1 %v2599_v2  ;;  %v1703_v1 = vld [vmem:[%s3274_s5 + $0x108] sm:$0xff]  ;;  %v1688_v2 = vld [vmem:[%s3274_s5 + $0x90] sm:$0xff]  ;;  %v2667_v30 = vpack.c.bf16 %v1711_v56, %v1710_v55 }
 0x21a   :  { %2346 = vmatprep.subr.bf16.mxu0 %v2345_v14  ;;  %2602 = vmatprep.subr.bf16.mxu1 %v2601_v6  ;;  %v2619_v14 = vpack.c.bf16 %v1671_v60, %v1670_v48  ;;  %v2651_v6 = vpack.c.bf16 %v1703_v1, %v1702_v63  ;;  %v2621_v11 = vpack.c.bf16 %v1689_v43, %v1688_v2  ;;  %v1729_v48 = vld [vmem:[%s3274_s5 + $0x1d8] sm:$0xff]  ;;  %v1712_v2 = vld [vmem:[%s3274_s5 + $0x150] sm:$0xff] }
 0x21b   :  { %v1713_v43 = vld [vmem:[%s3274_s5 + $0x158] sm:$0xff] }
 0x21d   :  { %2348 = vmatpush1.bf16.msra.mxu0 %v2347_v18  ;;  %2604 = vmatpush1.bf16.msra.mxu1 %v2603_v19  ;;  %v1705_v18 = vld [vmem:[%s3274_s5 + $0x118] sm:$0xff]  ;;  %v1690_v19 = vld [vmem:[%s3274_s5 + $0xa0] sm:$0xff] }
 0x21e   :  { %2350 = vmatprep.subr.bf16.mxu0 %v2349_v22  ;;  %2606 = vmatprep.subr.bf16.mxu1 %v2605_v23  ;;  %v1723_v22 = vld [vmem:[%s3274_s5 + $0x1a8] sm:$0xff]  ;;  %v2623_v23 = vpack.c.bf16 %v1673_v7, %v1672_v58  ;;  %v2655_v10 = vpack.c.bf16 %v1705_v18, %v1704_v17  ;;  %v2625_v27 = vpack.c.bf16 %v1691_v20, %v1690_v19  ;;  %v1714_v18 = vld [vmem:[%s3274_s5 + $0x160] sm:$0xff] }
 0x21f   :  { %v2657_v28 = vpack.c.bf16 %v1723_v22, %v1722_v21  ;;  %v2671_v7 = vpack.c.bf16 %v1713_v43, %v1712_v2  ;;  %v1683_v17 = vld [vmem:[%s3274_s5 + $0x68] sm:$0xff]  ;;  %v1700_v22 = vld [vmem:[%s3274_s5 + $0xf0] sm:$0xff] }
 0x220   :  { %v1715_v20 = vld [vmem:[%s3274_s5 + $0x168] sm:$0xff] }
 0x221   :  { %2352 = vmatpush1.bf16.msra.mxu0 %v2351_v31  ;;  %2608 = vmatpush1.bf16.msra.mxu1 %v2607_v0  ;;  %v1707_v31 = vld [vmem:[%s3274_s5 + $0x128] sm:$0xff]  ;;  %v1692_v0 = vld [vmem:[%s3274_s5 + $0xb0] sm:$0xff]  ;;  %v2675_v21 = vpack.c.bf16 %v1715_v20, %v1714_v18 }
 0x222   :  { %2354 = vmatprep.subr.bf16.mxu0 %v2353_v35  ;;  %2610 = vmatprep.subr.bf16.mxu1 %v2609_v36  ;;  %v2627_v35 = vpack.c.bf16 %v1675_v26, %v1674_v25  ;;  %v2659_v36 = vpack.c.bf16 %v1707_v31, %v1706_v29  ;;  %v2629_v39 = vpack.c.bf16 %v1693_v32, %v1692_v0  ;;  %v1733_v26 = vld [vmem:[%s3274_s5 + $0x1f8] sm:$0xff]  ;;  %v1716_v0 = vld [vmem:[%s3274_s5 + $0x170] sm:$0xff] }
 0x223   :  { %v1717_v32 = vld [vmem:[%s3274_s5 + $0x178] sm:$0xff] }
 0x224   :  { %v2679_v33 = vpack.c.bf16 %v1717_v32, %v1716_v0 }
 0x225   :  { %2356 = vmatpush1.bf16.msra.mxu0 %v2355_v45  ;;  %2612 = vmatpush1.bf16.msra.mxu1 %v2611_v4  ;;  %v1694_v45 = vld [vmem:[%s3274_s5 + $0xc0] sm:$0xff]  ;;  %v1695_v4 = vld [vmem:[%s3274_s5 + $0xc8] sm:$0xff] }
 0x226   :  { %2358 = vmatprep.subr.bf16.mxu0 %v2357_v50  ;;  %2614 = vmatprep.subr.bf16.mxu1 %v2613_v51  ;;  %v2663_v50 = vpack.c.bf16 %v1709_v44, %v1708_v42  ;;  %v1678_v51 = vld [vmem:[%s3274_s5 + $0x40] sm:$0xff]  ;;  %v2633_v53 = vpack.c.bf16 %v1695_v4, %v1694_v45 }
 0x227   :  { %v2635_v60 = vpack.c.bf16 %v1679_v52, %v1678_v51 }
 0x229   :  { %2360 = vmatpush1.bf16.msra.mxu0 %v2359_v57  ;;  %2616 = vmatpush1.bf16.msra.mxu1 %v2615_v59  ;;  %v1697_v57 = vld [vmem:[%s3274_s5 + $0xd8] sm:$0xff]  ;;  %v1728_v59 = vld [vmem:[%s3274_s5 + $0x1d0] sm:$0xff] }
 0x22a   :  { %2618 = vmatprep.subr.bf16.mxu0 %v2617_v61  ;;  %2650 = vmatprep.subr.bf16.mxu1 %v2649_v62  ;;  %v1680_v61 = vld [vmem:[%s3274_s5 + $0x50] sm:$0xff]  ;;  %v1681_v62 = vld [vmem:[%s3274_s5 + $0x58] sm:$0xff]  ;;  %v2637_v63 = vpack.c.bf16 %v1697_v57, %v1696_v9  ;;  %v2669_v1 = vpack.c.bf16 %v1729_v48, %v1728_v59 }
 0x22b   :  { %v2639_v58 = vpack.c.bf16 %v1681_v62, %v1680_v61 }
 0x22c   :  { %1376 = vmatmul.mubr.f32.vlgmr.msra.gmra.mrb[4].mxu0 %v562_v8  ;;  %1660 = vmatmul.mubr.f32.vlgmr.msra.gmra.mrb[4].mxu1 %v562_v8  ;;  %v2641_v8 = vpack.c.bf16 %v1699_v5, %v1698_v3 }
 0x22d   :  { %2620 = vmatpush3.bf16.msra.mxu0 %v2619_v14  ;;  %2652 = vmatpush3.bf16.msra.mxu1 %v2651_v6  ;;  %v1730_v14 = vld [vmem:[%s3274_s5 + $0x1e0] sm:$0xff]  ;;  %v1731_v6 = vld [vmem:[%s3274_s5 + $0x1e8] sm:$0xff] }
 0x22e   :  { %2622 = vmatprep.subr.bf16.mxu0 %v2621_v11  ;;  %2654 = vmatprep.subr.bf16.mxu1 %v2653_v16  ;;  %v2673_v11 = vpack.c.bf16 %v1731_v6, %v1730_v14  ;;  %v1682_v16 = vld [vmem:[%s3274_s5 + $0x60] sm:$0xff] }
 0x22f   :  { %v2643_v19 = vpack.c.bf16 %v1683_v17, %v1682_v16 }
 0x231   :  { %2624 = vmatpush3.bf16.msra.mxu0 %v2623_v23  ;;  %2656 = vmatpush3.bf16.msra.mxu1 %v2655_v10  ;;  %v1701_v23 = vld [vmem:[%s3274_s5 + $0xf8] sm:$0xff]  ;;  %v1732_v10 = vld [vmem:[%s3274_s5 + $0x1f0] sm:$0xff] }
 0x232   :  { %2626 = vmatprep.subr.bf16.mxu0 %v2625_v27  ;;  %2658 = vmatprep.subr.bf16.mxu1 %v2657_v28  ;;  %v2645_v25 = vpack.c.bf16 %v1701_v23, %v1700_v22  ;;  %v1684_v27 = vld [vmem:[%s3274_s5 + $0x70] sm:$0xff]  ;;  %v1685_v28 = vld [vmem:[%s3274_s5 + $0x78] sm:$0xff]  ;;  %v2677_v29 = vpack.c.bf16 %v1733_v26, %v1732_v10  ;;  %s2889_s5 = smov [#allocation13]  }
 0x233   :  { %v2647_v31 = vpack.c.bf16 %v1685_v28, %v1684_v27  ;;  %s1894_s12 = sshll.u32 %s2889_s5, 4  ;;  %s1895_s12 = int_to_ptr.vmem [resolvable:$true] %s1894_s12 }
 0x234   :  { %s2846_s13 = scalar_lea.vmem %s1895_s12, 128  ;;  %p2851_p7 = scmp.lt.s32.totalorder %s1895_s12, %s1895_s12 }
 0x235   :  { %2628 = vmatpush3.bf16.msra.mxu0 %v2627_v35  ;;  %2660 = vmatpush3.bf16.msra.mxu1 %v2659_v36  ;;  %v1081_v35 = vrot.slane %v1076_v34, %v234_v13  ;;  %v1089_v36 = vrot.slane %v1076_v34, %v242_v24  ;;  %p2847_p6 = scmp.ne.s32.totalorder %s1895_s12, %s2846_s13  ;;  %p2852_p8 = scmp.lt.s32.totalorder %s2846_s13, %s2846_s13 }
 0x236   :  { %2630 = vmatprep.subr.bf16.mxu0 %v2629_v39  ;;  %2662 = vmatprep.subr.bf16.mxu1 %v2661_v40 }
 0x237   :  { %p2853_p9 = por %p2852_p8, %p2851_p7 }
 0x239   :  { %2632 = vmatpush3.bf16.msra.mxu0 %v2631_v49  ;;  %2664 = vmatpush3.bf16.msra.mxu1 %v2663_v50  ;;  %p2854_p10 = pnand %p2853_p9, %p2847_p6 }
 0x23a   :  { %2634 = vmatprep.subr.bf16.mxu0 %v2633_v53  ;;  %2666 = vmatprep.subr.bf16.mxu1 %v2665_v54 }
 0x23d   :  { %2636 = vmatpush3.bf16.msra.mxu0 %v2635_v60  ;;  %2668 = vmatpush3.bf16.msra.mxu1 %v2667_v30 }
 0x23e   :  { %2638 = vmatprep.subr.bf16.mxu0 %v2637_v63  ;;  %2670 = vmatprep.subr.bf16.mxu1 %v2669_v1 }
 0x241   :  { %2640 = vmatpush3.bf16.msra.mxu0 %v2639_v58  ;;  %2672 = vmatpush3.bf16.msra.mxu1 %v2671_v7 }
 0x242   :  { %2642 = vmatprep.subr.bf16.mxu0 %v2641_v8  ;;  %2674 = vmatprep.subr.bf16.mxu1 %v2673_v11 }
 0x245   :  { %2644 = vmatpush3.bf16.msra.mxu0 %v2643_v19  ;;  %2676 = vmatpush3.bf16.msra.mxu1 %v2675_v21 }
 0x246   :  { %2646 = vmatprep.subr.bf16.mxu0 %v2645_v25  ;;  %2678 = vmatprep.subr.bf16.mxu1 %v2677_v29 }
 0x249   :  { %2648 = vmatpush3.bf16.msra.mxu0 %v2647_v31  ;;  %2680 = vmatpush3.bf16.msra.mxu1 %v2679_v33 }
 0x2ff   :  { %v1377_v39 = vpop.f32.mrb[4].mxu0  ;;  %v1661_v40 = vpop.f32.mrb[4].mxu1 }
 0x300   :  { %v2681_v42 = vadd.f32 %v1377_v39, %v1081_v35  ;;  %v2683_v44 = vadd.f32 %v1661_v40, %v1089_v36  ;;  %v1379_v45 = vpop.f32.mrb[5].mxu0  ;;  %v1663_v4 = vpop.f32.mrb[5].mxu1 }
 0x301   :  { %v2682_v46 = vadd.f32 %v1379_v45, %v1085_v37  ;;  %v2684_v47 = vadd.f32 %v1663_v4, %v1093_v38 }
 0x302   :  { %v1666_v13 = vmax.f32 %v2681_v42, 0.0  ;;  %v1668_v51 = vmax.f32 %v2683_v44, 0.0 }
 0x303   :  { %v1667_v49 = vmax.f32 %v2682_v46, 0.0  ;;  %v1669_v50 = vmax.f32 %v2684_v47, 0.0 }
 0x305   :  { %1805 = vmatprep.mubr.f32.mxu0 %v1667_v49  ;;  %1875 = vmatprep.mubr.f32.mxu1 %v1669_v50 }
 0x306   :  { %1806 = vmatmul.mubr.f32.vlgmr.msra.gmra.mrb[6].mxu0 %v1666_v13  ;;  %1876 = vmatmul.mubr.f32.vlgmr.msra.gmra.mrb[6].mxu1 %v1668_v51 }
 0x3d9   :  { %v1939_v15 = vpop.f32.mrb[6].mxu0  ;;  %v1974_v24 = vpop.f32.mrb[6].mxu1 }
 0x3da   :  { %v1940_v41 = vpop.f32.mrb[7].mxu0  ;;  %v1975_v52 = vpop.f32.mrb[7].mxu1 }
 0x3db   :  { %v1941_v53 = vadd.f32 %v1940_v41, %v1939_v15  ;;  %v1976_v54 = vadd.f32 %v1975_v52, %v1974_v24 }
 0x3dd   :  { %v1808_v55 = vadd.f32 %v1941_v53, %v1906_v12 }
 0x3df   :  { %v1878_v56 = vadd.f32 %v1976_v54, %v1808_v55 }
 0x3e1   :  { %v1881_v9 = vsub.f32 0.0, %v1878_v56 }
 0x3e3   :  { %v1882_v57 = vmul.f32 1.442695, %v1881_v9 }
 0x3e5   :  { %2709 = vpow2.f32 %v1882_v57 }
 0x3ef   :  { %v2710_v59 = vpop.eup %2709 }
 0x3f0   :  { %v1884_v48 = vadd.f32 1.0, %v2710_v59 }
 0x3f2   :  { %2711 = vrcp.f32 %v1884_v48 }
 0x3fc   :  { %v2712_v60 = vpop.eup %2711 }
 0x3fd   :  { %1887 = vst.msk [vmem:[#allocation13] sm:$0xff] %vm1886_vm0, %v2712_v60 }
 0x3fe   :  { %2857 = shalt.err (!%p2854_p10)
}
 0x3ff   :  { %s2858_s8 = scalar_lea.hbm %s3276_s7, 128 }
 0x400   :  { %p2859_p11 = scmp.ne.s32.totalorder %s3276_s7, %s2858_s8  ;;  %p2862_p12 = scmp.lt.u32.totalorder %s2858_s8, %s3276_s7 }
 0x402   :  { %p2864_p13 = pnand %p2862_p12, %p2859_p11 }
 0x404   :  { %2867 = shalt.err (!%p2864_p13)
}
 0x405   :  { %1897 = dma.vmem_to_hbm [thread:$0]  %s1895_s12, 128, %s3276_s7, [#allocation4]  }
 0x406   :  { %2876 = dma.done.wait [#allocation4], 128  }
 0x407   :  { %2877 = vsyncadd [#allocation4], 4294967168 }
 0x408   :  { %1901 = vsyncpa [#allocation3], 1 }
 0x409   :  { %1902 = vsyncpa [#allocation6], 1 }
 0x40a   :  { %1903 = vsyncpa [#allocation9], 1 }
 0x40b   :  { %1904 = vsyncpa [#allocation12], 1 }
 0x40c   :  { %1905 = vsyncpa [#allocation4], 1 }

</bundles_post_ra>
